<compile_context>
chip_gen: v7x
topology: tpu7x:2x2x1
jax: 0.10.0
libtpu: 0.0.40
codegen_flags: <defaults>
</compile_context>

<pallas_src>
import functools
import math

import numpy as np
import jax
import jax.numpy as jnp
from jax import lax
from jax.experimental import pallas as pl
from jax.experimental.pallas import tpu as pltpu

_NEG = -1e9  # masked-logit fill value (stands in for torch masked_fill(-inf))


# ---------------------------------------------------------------------------
# Kernel: ONE invocation per batch tile; decode steps are an unrolled loop.
# ---------------------------------------------------------------------------
def _decoder_cell_kernel(TB, N, E, H, K, clip,
                         x2d_ref, graph_ref, wk1_ref, wv_ref, wk2_ref,
                         wqf_ref, wqsa_ref, wqsb_ref, wout_ref,
                         wph1_ref, wph2_ref, out_ref):
    D = E // H
    LANE = out_ref.shape[-1]
    inv_sqrt_d = 1.0 / math.sqrt(D)
    inv_sqrt_e = 1.0 / math.sqrt(E)

    # ---- compute_static (straight-line prologue, once per batch tile) ----
    x2d = x2d_ref[...]                                              # (TB*N, E)
    k1 = jnp.dot(x2d, wk1_ref[...],
                 preferred_element_type=jnp.float32).reshape(TB, N, E)
    v = jnp.dot(x2d, wv_ref[...],
                preferred_element_type=jnp.float32).reshape(TB, N, E)
    k2 = jnp.dot(x2d, wk2_ref[...],
                 preferred_element_type=jnp.float32).reshape(TB, N, E)
    q_fixed = jnp.dot(graph_ref[...], wqf_ref[...],
                      preferred_element_type=jnp.float32)           # (TB, E)
    x3d = x2d.reshape(TB, N, E)

    # Head-selector matrices built from iotas (no input DMA): gsel[e,h]=1 iff
    # feature e belongs to head h, so per-head reductions become MXU matmuls.
    e_i = lax.broadcasted_iota(jnp.int32, (E, H), 0)
    h_i = lax.broadcasted_iota(jnp.int32, (E, H), 1)
    gsel = jnp.logical_and(e_i >= h_i * D, e_i < (h_i + 1) * D).astype(jnp.float32)
    e_j = lax.broadcasted_iota(jnp.int32, (H, E), 1)
    h_j = lax.broadcasted_iota(jnp.int32, (H, E), 0)
    gsel_t = jnp.logical_and(e_j >= h_j * D, e_j < (h_j + 1) * D).astype(jnp.float32)

    # (N, LANE) scatter matrix: places the N-wide log_p row into the first N
    # of 128 lanes through the MXU so the output store is a full-width vst.
    r_s = lax.broadcasted_iota(jnp.int32, (N, LANE), 0)
    c_s = lax.broadcasted_iota(jnp.int32, (N, LANE), 1)
    scatter = (r_s == c_s).astype(jnp.float32)

    colN = lax.broadcasted_iota(jnp.int32, (TB, N), 1).astype(jnp.float32)
    colL = lax.broadcasted_iota(jnp.int32, (TB, LANE), 1)

    visited = jnp.zeros((TB, N), jnp.float32)                       # env mask
    first = jnp.broadcast_to(wph1_ref[...], (TB, E))                # W_placeholder[:E]
    cur = jnp.broadcast_to(wph2_ref[...], (TB, E))                  # W_placeholder[E:]

    # ---- sequential decode (statically unrolled, K = cluster_k) ----
    for step in range(K):
        # step_context = concat(first, cur); split matmul avoids the lane
        # concat.  NOTE: M = TB rows (<8 at test size) -> these small matmuls
        # are MXU-latency-bound; use batch tiles >= 8 rows when scaling up.
        q_step = (jnp.dot(first, wqsa_ref[...], preferred_element_type=jnp.float32) +
                  jnp.dot(cur, wqsb_ref[...], preferred_element_type=jnp.float32))
        q1 = q_fixed + q_step                                       # (TB, E)

        # ---- MHA(Q1, K1, V) with H heads (need_W=False) ----
        p = q1[:, None, :] * k1                                     # (TB, N, E)
        scores = jnp.dot(p.reshape(TB * N, E), gsel,
                         preferred_element_type=jnp.float32).reshape(TB, N, H)
        scores = scores * inv_sqrt_d
        scores = jnp.where(visited[:, :, None] > 0.0, _NEG, scores)
        m = jnp.max(scores, axis=1, keepdims=True)
        ex = jnp.exp(scores - m)
        # exact reciprocal: keeps the downstream greedy argmax bit-stable
        attn = ex / jnp.sum(ex, axis=1, keepdims=True)              # (TB, N, H)
        attn_e = jnp.dot(attn.reshape(TB * N, H), gsel_t,
                         preferred_element_type=jnp.float32).reshape(TB, N, E)
        mha = jnp.sum(attn_e * v, axis=1)                           # (TB, E)
        q2 = jnp.dot(mha, wout_ref[...], preferred_element_type=jnp.float32)

        # ---- SHA: single-head clipped logits over K2 ----
        raw = jnp.einsum('bqe,bne->bqn', q2[:, None, :], k2,
                         preferred_element_type=jnp.float32).reshape(TB, N)
        logits = clip * jnp.tanh(raw * inv_sqrt_e)
        logits = jnp.where(visited > 0.0, _NEG, logits)             # (TB, N)

        # ---- log_softmax + greedy (TopK k=1) selection ----
        lm = jnp.max(logits, axis=-1, keepdims=True)
        lse = lm + jnp.log(jnp.sum(jnp.exp(logits - lm), axis=-1, keepdims=True))
        log_p = logits - lse                                        # (TB, N)
        is_max = log_p >= jnp.max(log_p, axis=-1, keepdims=True)
        idx_f = jnp.min(jnp.where(is_max, colN, float(N)),
                        axis=-1, keepdims=True)                     # (TB, 1)
        # TODO(synk): CategoricalSampler ('sampling' decode_type) would need
        # the in-kernel PRNG (pltpu.prng_seed + Gumbel-max); only greedy here.

        # Lane-dense output store: log_p in lanes [0, N), greedy index in lane N.
        slab = jnp.dot(log_p, scatter, preferred_element_type=jnp.float32)  # (TB, LANE)
        out_ref[step] = jnp.where(colL == N, idx_f, slab)

        # ---- Env._get_step: update visited mask + step context ----
        onehot = (colN == idx_f).astype(jnp.float32)                # (TB, N)
        visited = jnp.maximum(visited, onehot)
        cur = jnp.einsum('bqn,bne->bqe', onehot[:, None, :], x3d,
                         preferred_element_type=jnp.float32).reshape(TB, E)
        if step == 0:
            first = cur
        # TODO(synk): Env is not provided in the spec; standard AM-style
        # step_context = concat(first selected node emb, current node emb).


# ---------------------------------------------------------------------------
# Wrapper
# ---------------------------------------------------------------------------
def decoder_cell_forward(node_embeddings, graph_embedding, params, *,
                         cluster_k=3, n_heads=8, clip=10.0, batch_tile=None):
    """Greedy-decode cluster_k nodes. Returns (pi, gathered log_p, all log_p)."""
    B, N, E = node_embeddings.shape
    assert E % n_heads == 0
    assert cluster_k <= N, "cluster_k > N would decode an out-of-range index"
    LANE = 128
    assert N < LANE, "greedy index is packed into lane N of the output slab"
    TB = B if batch_tile is None else batch_tile   # v7x: set TB<B (mult. of 8)
    assert B % TB == 0
    num_tiles = B // TB

    x2d = node_embeddings.reshape(B * N, E)        # flatten OUTSIDE the kernel
    wqs = params["wq_step"]                        # (2E, E), in->out layout
    wqs_first, wqs_cur = wqs[:E], wqs[E:]
    wph = params["w_placeholder"]
    wph_first = wph[:E].reshape(1, E)
    wph_cur = wph[E:].reshape(1, E)

    const2 = lambda i: (0, 0)
    kernel = functools.partial(_decoder_cell_kernel, TB, N, E, n_heads,
                               cluster_k, float(clip))

    # Constant-index inputs are only fetched once per tile change; with the
    # default single batch tile there is one grid step, so extra pipeline
    # buffers are irrelevant (pl.Buffered(1) only matters when num_tiles > 1
    # and VMEM is tight, e.g. v7x's 64 MiB).
    slab = pl.pallas_call(
        kernel,
        grid=(num_tiles,),
        in_specs=[
            pl.BlockSpec((TB * N, E), lambda i: (i, 0)),   # node embeddings (flat)
            pl.BlockSpec((TB, E), lambda i: (i, 0)),       # graph embedding
            pl.BlockSpec((E, E), const2),                  # Wk1
            pl.BlockSpec((E, E), const2),                  # Wv
            pl.BlockSpec((E, E), const2),                  # Wk2
            pl.BlockSpec((E, E), const2),                  # Wq_fixed
            pl.BlockSpec((E, E), const2),                  # Wq_step[:E]  (first)
            pl.BlockSpec((E, E), const2),                  # Wq_step[E:]  (current)
            pl.BlockSpec((E, E), const2),                  # Wout
            pl.BlockSpec((1, E), const2),                  # W_placeholder[:E]
            pl.BlockSpec((1, E), const2),                  # W_placeholder[E:]
        ],
        out_specs=pl.BlockSpec((cluster_k, TB, LANE), lambda i: (0, i, 0)),
        out_shape=jax.ShapeDtypeStruct((cluster_k, B, LANE), jnp.float32),
        compiler_params=pltpu.CompilerParams(
            dimension_semantics=("parallel",)),            # batch tiles independent
    )(x2d, graph_embedding, params["wk1"], params["wv"], params["wk2"],
      params["wq_fixed"], wqs_first, wqs_cur, params["wout"],
      wph_first, wph_cur)

    log_ps = jnp.transpose(slab[:, :, :N], (1, 0, 2))                 # (B, k, N)
    pi = jnp.transpose(slab[:, :, N], (1, 0)).astype(jnp.int32)       # (B, k)
    log_p_sel = jnp.take_along_axis(log_ps, pi[:, :, None], axis=2)   # (B, k, 1)
    return pi, log_p_sel, log_ps


# ---------------------------------------------------------------------------
# Deterministic parameters (mirrors torch orthogonal_ / uniform_ init).
# ---------------------------------------------------------------------------
def _orthogonal(seed, out_features, in_features, gain=1.0):
    rng = np.random.default_rng(seed)
    a = rng.standard_normal((out_features, in_features)).astype(np.float64)
    transpose = out_features < in_features
    if transpose:
        a = a.T
    q, r = np.linalg.qr(a)
    q *= np.sign(np.diag(r))
    if transpose:
        q = q.T
    w_torch = gain * q                                  # torch layout (out, in)
    return jnp.asarray(w_torch.T, dtype=jnp.float32)    # kernel layout (in, out)


def make_params(embed_dim=64):
    E = embed_dim
    rng = np.random.default_rng(7)
    return {
        "wk1": _orthogonal(1, E, E, 1.0),
        "wv": _orthogonal(2, E, E, 1.0),
        "wk2": _orthogonal(3, E, E, 1.0),
        "wq_fixed": _orthogonal(4, E, E, 1.0),
        "wq_step": _orthogonal(5, E, 2 * E, 1.0),
        "wout": _orthogonal(6, E, E, 0.01),
        "w_placeholder": jnp.asarray(rng.uniform(-1.0, 1.0, size=(2 * E,)),
                                     jnp.float32),
    }


# Pure-JAX reference (same math / same masking constant) for verification.
def reference_forward(node, graph, params, *, cluster_k=3, n_heads=8, clip=10.0):
    B, N, E = node.shape
    D = E // n_heads
    k1 = node @ params["wk1"]
    v = node @ params["wv"]
    k2 = node @ params["wk2"]
    q_fixed = graph @ params["wq_fixed"]
    visited = jnp.zeros((B, N), bool)
    ctx = jnp.broadcast_to(params["w_placeholder"][None, :], (B, 2 * E))
    first = None
    log_ps, tours = [], []
    for t in range(cluster_k):
        q1 = q_fixed + ctx @ params["wq_step"]
        qh = q1.reshape(B, n_heads, D)
        kh = k1.reshape(B, N, n_heads, D).transpose(0, 2, 1, 3)
        vh = v.reshape(B, N, n_heads, D).transpose(0, 2, 1, 3)
        sc = jnp.einsum('bhd,bhnd->bhn', qh, kh) / math.sqrt(D)
        sc = jnp.where(visited[:, None, :], _NEG, sc)
        at = jax.nn.softmax(sc, axis=-1)
        mh = jnp.einsum('bhn,bhnd->bhd', at, vh).reshape(B, E)
        q2 = mh @ params["wout"]
        logits = clip * jnp.tanh(jnp.einsum('be,bne->bn', q2, k2) / math.sqrt(E))
        logits = jnp.where(visited, _NEG, logits)
        log_p = jax.nn.log_softmax(logits, axis=-1)
        idx = jnp.argmax(log_p, axis=-1)
        log_ps.append(log_p)
        tours.append(idx)
        visited = visited | (jnp.arange(N)[None, :] == idx[:, None])
        cur = node[jnp.arange(B), idx]
        if t == 0:
            first = cur
        ctx = jnp.concatenate([first, cur], axis=-1)
    return jnp.stack(tours, 1), jnp.stack(log_ps, 1)


if __name__ == "__main__":
    B, N, E, H, K = 2, 8, 64, 8, 3
    key = jax.random.PRNGKey(0)
    k_node, k_graph = jax.random.split(key)
    node = jax.random.normal(k_node, (B, N, E), dtype=jnp.float32)
    graph = jax.random.normal(k_graph, (B, E), dtype=jnp.float32)
    params = make_params(E)

    pi, log_p_sel, log_ps = decoder_cell_forward(node, graph, params,
                                                 cluster_k=K, n_heads=H, clip=10.0)
    pi = jax.block_until_ready(pi)
    log_ps = jax.block_until_ready(log_ps)

    ref_pi, ref_log_ps = reference_forward(node, graph, params,
                                           cluster_k=K, n_heads=H, clip=10.0)
    ref_pi = jax.block_until_ready(ref_pi)

    if not np.array_equal(np.asarray(pi), np.asarray(ref_pi)):
        raise AssertionError(f"tour mismatch: {np.asarray(pi)} vs {np.asarray(ref_pi)}")
    if not np.allclose(np.asarray(log_ps), np.asarray(ref_log_ps),
                       rtol=1e-3, atol=1e-3):
        raise AssertionError("log-prob mismatch vs reference")

    print("KERNEL_OK")
</pallas_src>

<mosaic_0001>
module attributes {stable_mosaic.version = 11 : i64} {
  func.func @_decoder_cell_kernel(%arg0: i32, %arg1: memref<16x64xf32, #tpu.memory_space<vmem>>, %arg2: memref<2x64xf32, #tpu.memory_space<vmem>>, %arg3: memref<64x64xf32, #tpu.memory_space<vmem>>, %arg4: memref<64x64xf32, #tpu.memory_space<vmem>>, %arg5: memref<64x64xf32, #tpu.memory_space<vmem>>, %arg6: memref<64x64xf32, #tpu.memory_space<vmem>>, %arg7: memref<64x64xf32, #tpu.memory_space<vmem>>, %arg8: memref<64x64xf32, #tpu.memory_space<vmem>>, %arg9: memref<64x64xf32, #tpu.memory_space<vmem>>, %arg10: memref<1x64xf32, #tpu.memory_space<vmem>>, %arg11: memref<1x64xf32, #tpu.memory_space<vmem>>, %arg12: memref<3x2x128xf32, #tpu.memory_space<vmem>>) attributes {dimension_semantics = [#tpu.dimension_semantics<parallel>], iteration_bounds = array<i64: 1>, scalar_prefetch = 0 : i64, scratch_operands = 0 : i64, tpu.core_type = #tpu.core_type<tc>, window_params = [{transform_indices = @transform_0, window_bounds = array<i64: 16, 64>}, {transform_indices = @transform_1, window_bounds = array<i64: 2, 64>}, {pipeline_mode = #tpu.pipeline_mode<synchronous>, transform_indices = @transform_2, window_bounds = array<i64: 64, 64>}, {pipeline_mode = #tpu.pipeline_mode<synchronous>, transform_indices = @transform_3, window_bounds = array<i64: 64, 64>}, {pipeline_mode = #tpu.pipeline_mode<synchronous>, transform_indices = @transform_4, window_bounds = array<i64: 64, 64>}, {pipeline_mode = #tpu.pipeline_mode<synchronous>, transform_indices = @transform_5, window_bounds = array<i64: 64, 64>}, {pipeline_mode = #tpu.pipeline_mode<synchronous>, transform_indices = @transform_6, window_bounds = array<i64: 64, 64>}, {pipeline_mode = #tpu.pipeline_mode<synchronous>, transform_indices = @transform_7, window_bounds = array<i64: 64, 64>}, {pipeline_mode = #tpu.pipeline_mode<synchronous>, transform_indices = @transform_8, window_bounds = array<i64: 64, 64>}, {pipeline_mode = #tpu.pipeline_mode<synchronous>, transform_indices = @transform_9, window_bounds = array<i64: 1, 64>}, {pipeline_mode = #tpu.pipeline_mode<synchronous>, transform_indices = @transform_10, window_bounds = array<i64: 1, 64>}, {transform_indices = @transform_11, window_bounds = array<i64: 3, 2, 128>}]} {
    %c0 = arith.constant 0 : index
    %c0_0 = arith.constant 0 : index
    %0 = vector.load %arg1[%c0, %c0_0] : memref<16x64xf32, #tpu.memory_space<vmem>>, vector<16x64xf32>
    %c0_1 = arith.constant 0 : index
    %c0_2 = arith.constant 0 : index
    %1 = vector.load %arg3[%c0_1, %c0_2] : memref<64x64xf32, #tpu.memory_space<vmem>>, vector<64x64xf32>
    %cst = arith.constant dense<0.000000e+00> : vector<16x64xf32>
    %2 = tpu.matmul %0, %1, %cst {dimension_numbers = #tpu.dot_dimension_numbers<[1], [0], [0], [1], [0, 0, 1, 1], [], []>} : vector<16x64xf32>, vector<64x64xf32>, vector<16x64xf32> -> vector<16x64xf32>
    %3 = vector.shape_cast %2 : vector<16x64xf32> to vector<2x8x64xf32>
    %c0_3 = arith.constant 0 : index
    %c0_4 = arith.constant 0 : index
    %4 = vector.load %arg4[%c0_3, %c0_4] : memref<64x64xf32, #tpu.memory_space<vmem>>, vector<64x64xf32>
    %cst_5 = arith.constant dense<0.000000e+00> : vector<16x64xf32>
    %5 = tpu.matmul %0, %4, %cst_5 {dimension_numbers = #tpu.dot_dimension_numbers<[1], [0], [0], [1], [0, 0, 1, 1], [], []>} : vector<16x64xf32>, vector<64x64xf32>, vector<16x64xf32> -> vector<16x64xf32>
    %6 = vector.shape_cast %5 : vector<16x64xf32> to vector<2x8x64xf32>
    %c0_6 = arith.constant 0 : index
    %c0_7 = arith.constant 0 : index
    %7 = vector.load %arg5[%c0_6, %c0_7] : memref<64x64xf32, #tpu.memory_space<vmem>>, vector<64x64xf32>
    %cst_8 = arith.constant dense<0.000000e+00> : vector<16x64xf32>
    %8 = tpu.matmul %0, %7, %cst_8 {dimension_numbers = #tpu.dot_dimension_numbers<[1], [0], [0], [1], [0, 0, 1, 1], [], []>} : vector<16x64xf32>, vector<64x64xf32>, vector<16x64xf32> -> vector<16x64xf32>
    %9 = vector.shape_cast %8 : vector<16x64xf32> to vector<2x8x64xf32>
    %c0_9 = arith.constant 0 : index
    %c0_10 = arith.constant 0 : index
    %10 = vector.load %arg2[%c0_9, %c0_10] : memref<2x64xf32, #tpu.memory_space<vmem>>, vector<2x64xf32>
    %c0_11 = arith.constant 0 : index
    %c0_12 = arith.constant 0 : index
    %11 = vector.load %arg6[%c0_11, %c0_12] : memref<64x64xf32, #tpu.memory_space<vmem>>, vector<64x64xf32>
    %cst_13 = arith.constant dense<0.000000e+00> : vector<2x64xf32>
    %12 = tpu.matmul %10, %11, %cst_13 {dimension_numbers = #tpu.dot_dimension_numbers<[1], [0], [0], [1], [0, 0, 1, 1], [], []>} : vector<2x64xf32>, vector<64x64xf32>, vector<2x64xf32> -> vector<2x64xf32>
    %13 = vector.shape_cast %0 : vector<16x64xf32> to vector<2x8x64xf32>
    %14 = tpu.iota {dimensions = array<i32: 0>} : vector<64x8xi32>
    %15 = tpu.iota {dimensions = array<i32: 1>} : vector<64x8xi32>
    %c8_i32 = arith.constant 8 : i32
    %16 = vector.broadcast %c8_i32 : i32 to vector<64x8xi32>
    %17 = arith.muli %15, %16 : vector<64x8xi32>
    %18 = arith.cmpi sge, %14, %17 : vector<64x8xi32>
    %c1_i32 = arith.constant 1 : i32
    %19 = vector.broadcast %c1_i32 : i32 to vector<64x8xi32>
    %20 = arith.addi %15, %19 : vector<64x8xi32>
    %c8_i32_14 = arith.constant 8 : i32
    %21 = vector.broadcast %c8_i32_14 : i32 to vector<64x8xi32>
    %22 = arith.muli %20, %21 : vector<64x8xi32>
    %23 = arith.cmpi slt, %14, %22 : vector<64x8xi32>
    %24 = arith.andi %18, %23 : vector<64x8xi1>
    %25 = arith.extui %24 : vector<64x8xi1> to vector<64x8xi32>
    %26 = arith.sitofp %25 : vector<64x8xi32> to vector<64x8xf32>
    %27 = tpu.iota {dimensions = array<i32: 1>} : vector<8x64xi32>
    %28 = tpu.iota {dimensions = array<i32: 0>} : vector<8x64xi32>
    %c8_i32_15 = arith.constant 8 : i32
    %29 = vector.broadcast %c8_i32_15 : i32 to vector<8x64xi32>
    %30 = arith.muli %28, %29 : vector<8x64xi32>
    %31 = arith.cmpi sge, %27, %30 : vector<8x64xi32>
    %c1_i32_16 = arith.constant 1 : i32
    %32 = vector.broadcast %c1_i32_16 : i32 to vector<8x64xi32>
    %33 = arith.addi %28, %32 : vector<8x64xi32>
    %c8_i32_17 = arith.constant 8 : i32
    %34 = vector.broadcast %c8_i32_17 : i32 to vector<8x64xi32>
    %35 = arith.muli %33, %34 : vector<8x64xi32>
    %36 = arith.cmpi slt, %27, %35 : vector<8x64xi32>
    %37 = arith.andi %31, %36 : vector<8x64xi1>
    %38 = arith.extui %37 : vector<8x64xi1> to vector<8x64xi32>
    %39 = arith.sitofp %38 : vector<8x64xi32> to vector<8x64xf32>
    %40 = tpu.iota {dimensions = array<i32: 0>} : vector<8x128xi32>
    %41 = tpu.iota {dimensions = array<i32: 1>} : vector<8x128xi32>
    %42 = arith.cmpi eq, %40, %41 : vector<8x128xi32>
    %43 = arith.extui %42 : vector<8x128xi1> to vector<8x128xi32>
    %44 = arith.sitofp %43 : vector<8x128xi32> to vector<8x128xf32>
    %45 = tpu.iota {dimensions = array<i32: 1>} : vector<2x8xi32>
    %46 = arith.sitofp %45 : vector<2x8xi32> to vector<2x8xf32>
    %47 = tpu.iota {dimensions = array<i32: 1>} : vector<2x128xi32>
    %cst_18 = arith.constant 0.000000e+00 : f32
    %48 = vector.broadcast %cst_18 : f32 to vector<2x8xf32>
    %c0_19 = arith.constant 0 : index
    %c0_20 = arith.constant 0 : index
    %49 = vector.load %arg10[%c0_19, %c0_20] : memref<1x64xf32, #tpu.memory_space<vmem>>, vector<1x64xf32>
    %50 = vector.shape_cast %49 : vector<1x64xf32> to vector<1x64xf32>
    %51 = vector.broadcast %50 : vector<1x64xf32> to vector<2x64xf32>
    %c0_21 = arith.constant 0 : index
    %c0_22 = arith.constant 0 : index
    %52 = vector.load %arg11[%c0_21, %c0_22] : memref<1x64xf32, #tpu.memory_space<vmem>>, vector<1x64xf32>
    %53 = vector.shape_cast %52 : vector<1x64xf32> to vector<1x64xf32>
    %54 = vector.broadcast %53 : vector<1x64xf32> to vector<2x64xf32>
    %c0_23 = arith.constant 0 : index
    %c0_24 = arith.constant 0 : index
    %55 = vector.load %arg7[%c0_23, %c0_24] : memref<64x64xf32, #tpu.memory_space<vmem>>, vector<64x64xf32>
    %cst_25 = arith.constant dense<0.000000e+00> : vector<2x64xf32>
    %56 = tpu.matmul %51, %55, %cst_25 {dimension_numbers = #tpu.dot_dimension_numbers<[1], [0], [0], [1], [0, 0, 1, 1], [], []>} : vector<2x64xf32>, vector<64x64xf32>, vector<2x64xf32> -> vector<2x64xf32>
    %c0_26 = arith.constant 0 : index
    %c0_27 = arith.constant 0 : index
    %57 = vector.load %arg8[%c0_26, %c0_27] : memref<64x64xf32, #tpu.memory_space<vmem>>, vector<64x64xf32>
    %cst_28 = arith.constant dense<0.000000e+00> : vector<2x64xf32>
    %58 = tpu.matmul %54, %57, %cst_28 {dimension_numbers = #tpu.dot_dimension_numbers<[1], [0], [0], [1], [0, 0, 1, 1], [], []>} : vector<2x64xf32>, vector<64x64xf32>, vector<2x64xf32> -> vector<2x64xf32>
    %59 = arith.addf %56, %58 : vector<2x64xf32>
    %60 = arith.addf %12, %59 : vector<2x64xf32>
    %61 = vector.shape_cast %60 : vector<2x64xf32> to vector<2x1x64xf32>
    %62 = vector.broadcast %61 : vector<2x1x64xf32> to vector<2x8x64xf32>
    %63 = arith.mulf %62, %3 : vector<2x8x64xf32>
    %64 = vector.shape_cast %63 : vector<2x8x64xf32> to vector<16x64xf32>
    %cst_29 = arith.constant dense<0.000000e+00> : vector<16x8xf32>
    %65 = tpu.matmul %64, %26, %cst_29 {dimension_numbers = #tpu.dot_dimension_numbers<[1], [0], [0], [1], [0, 0, 1, 1], [], []>} : vector<16x64xf32>, vector<64x8xf32>, vector<16x8xf32> -> vector<16x8xf32>
    %66 = vector.shape_cast %65 : vector<16x8xf32> to vector<2x8x8xf32>
    %cst_30 = arith.constant 0.353553385 : f32
    %67 = vector.broadcast %cst_30 : f32 to vector<2x8x8xf32>
    %68 = arith.mulf %66, %67 : vector<2x8x8xf32>
    %69 = vector.shape_cast %48 : vector<2x8xf32> to vector<2x8x1xf32>
    %cst_31 = arith.constant 0.000000e+00 : f32
    %70 = vector.broadcast %cst_31 : f32 to vector<2x8x1xf32>
    %71 = arith.cmpf ogt, %69, %70 : vector<2x8x1xf32>
    %cst_32 = arith.constant -1.000000e+09 : f32
    %72 = vector.shape_cast %71 : vector<2x8x1xi1> to vector<2x8x1xi1>
    %73 = vector.broadcast %72 : vector<2x8x1xi1> to vector<2x8x8xi1>
    %74 = vector.broadcast %cst_32 : f32 to vector<2x8x8xf32>
    %75 = arith.select %73, %74, %68 : vector<2x8x8xi1>, vector<2x8x8xf32>
    %cst_33 = arith.constant dense<0xFF800000> : vector<2x8xf32>
    %76 = vector.multi_reduction <maximumf>, %75, %cst_33 [1] : vector<2x8x8xf32> to vector<2x8xf32>
    %77 = vector.shape_cast %76 : vector<2x8xf32> to vector<2x1x8xf32>
    %78 = vector.broadcast %77 : vector<2x1x8xf32> to vector<2x8x8xf32>
    %79 = arith.subf %75, %78 : vector<2x8x8xf32>
    %80 = math.exp %79 : vector<2x8x8xf32>
    %cst_34 = arith.constant dense<0.000000e+00> : vector<2x8xf32>
    %81 = vector.multi_reduction <add>, %80, %cst_34 [1] : vector<2x8x8xf32> to vector<2x8xf32>
    %82 = vector.shape_cast %81 : vector<2x8xf32> to vector<2x1x8xf32>
    %83 = vector.broadcast %82 : vector<2x1x8xf32> to vector<2x8x8xf32>
    %84 = arith.divf %80, %83 : vector<2x8x8xf32>
    %85 = vector.shape_cast %84 : vector<2x8x8xf32> to vector<16x8xf32>
    %cst_35 = arith.constant dense<0.000000e+00> : vector<16x64xf32>
    %86 = tpu.matmul %85, %39, %cst_35 {dimension_numbers = #tpu.dot_dimension_numbers<[1], [0], [0], [1], [0, 0, 1, 1], [], []>} : vector<16x8xf32>, vector<8x64xf32>, vector<16x64xf32> -> vector<16x64xf32>
    %87 = vector.shape_cast %86 : vector<16x64xf32> to vector<2x8x64xf32>
    %88 = arith.mulf %87, %6 : vector<2x8x64xf32>
    %cst_36 = arith.constant dense<0.000000e+00> : vector<2x64xf32>
    %89 = vector.multi_reduction <add>, %88, %cst_36 [1] : vector<2x8x64xf32> to vector<2x64xf32>
    %c0_37 = arith.constant 0 : index
    %c0_38 = arith.constant 0 : index
    %90 = vector.load %arg9[%c0_37, %c0_38] : memref<64x64xf32, #tpu.memory_space<vmem>>, vector<64x64xf32>
    %cst_39 = arith.constant dense<0.000000e+00> : vector<2x64xf32>
    %91 = tpu.matmul %89, %90, %cst_39 {dimension_numbers = #tpu.dot_dimension_numbers<[1], [0], [0], [1], [0, 0, 1, 1], [], []>} : vector<2x64xf32>, vector<64x64xf32>, vector<2x64xf32> -> vector<2x64xf32>
    %92 = vector.shape_cast %91 : vector<2x64xf32> to vector<2x1x64xf32>
    "tpu.trace_start"() <{level = 10 : i32, message = "bqe,bne->bqn"}> : () -> ()
    %cst_40 = arith.constant dense<0.000000e+00> : vector<2x1x8xf32>
    %93 = tpu.matmul %92, %9, %cst_40 {dimension_numbers = #tpu.dot_dimension_numbers<[2], [2], [1], [1], [0, 0, 0, 1, 1, 1], [0], [0]>} : vector<2x1x64xf32>, vector<2x8x64xf32>, vector<2x1x8xf32> -> vector<2x1x8xf32>
    "tpu.trace_stop"() : () -> ()
    %94 = vector.shape_cast %93 : vector<2x1x8xf32> to vector<2x8xf32>
    %cst_41 = arith.constant 1.250000e-01 : f32
    %95 = vector.broadcast %cst_41 : f32 to vector<2x8xf32>
    %96 = arith.mulf %94, %95 : vector<2x8xf32>
    %97 = math.tanh %96 : vector<2x8xf32>
    %cst_42 = arith.constant 1.000000e+01 : f32
    %98 = vector.broadcast %cst_42 : f32 to vector<2x8xf32>
    %99 = arith.mulf %98, %97 : vector<2x8xf32>
    %cst_43 = arith.constant 0.000000e+00 : f32
    %100 = vector.broadcast %cst_43 : f32 to vector<2x8xf32>
    %101 = arith.cmpf ogt, %48, %100 : vector<2x8xf32>
    %cst_44 = arith.constant -1.000000e+09 : f32
    %102 = vector.broadcast %cst_44 : f32 to vector<2x8xf32>
    %103 = arith.select %101, %102, %99 : vector<2x8xi1>, vector<2x8xf32>
    %cst_45 = arith.constant dense<0xFF800000> : vector<2xf32>
    %104 = vector.multi_reduction <maximumf>, %103, %cst_45 [1] : vector<2x8xf32> to vector<2xf32>
    %105 = vector.shape_cast %104 : vector<2xf32> to vector<2x1xf32>
    %106 = vector.broadcast %105 : vector<2x1xf32> to vector<2x8xf32>
    %107 = arith.subf %103, %106 : vector<2x8xf32>
    %108 = math.exp %107 : vector<2x8xf32>
    %cst_46 = arith.constant dense<0.000000e+00> : vector<2xf32>
    %109 = vector.multi_reduction <add>, %108, %cst_46 [1] : vector<2x8xf32> to vector<2xf32>
    %110 = vector.shape_cast %109 : vector<2xf32> to vector<2x1xf32>
    %111 = math.log %110 : vector<2x1xf32>
    %112 = arith.addf %105, %111 : vector<2x1xf32>
    %113 = vector.broadcast %112 : vector<2x1xf32> to vector<2x8xf32>
    %114 = arith.subf %103, %113 : vector<2x8xf32>
    %cst_47 = arith.constant dense<0xFF800000> : vector<2xf32>
    %115 = vector.multi_reduction <maximumf>, %114, %cst_47 [1] : vector<2x8xf32> to vector<2xf32>
    %116 = vector.shape_cast %115 : vector<2xf32> to vector<2x1xf32>
    %117 = vector.broadcast %116 : vector<2x1xf32> to vector<2x8xf32>
    %118 = arith.cmpf oge, %114, %117 : vector<2x8xf32>
    %cst_48 = arith.constant 8.000000e+00 : f32
    %119 = vector.broadcast %cst_48 : f32 to vector<2x8xf32>
    %120 = arith.select %118, %46, %119 : vector<2x8xi1>, vector<2x8xf32>
    %cst_49 = arith.constant dense<0x7F800000> : vector<2xf32>
    %121 = vector.multi_reduction <minimumf>, %120, %cst_49 [1] : vector<2x8xf32> to vector<2xf32>
    %122 = vector.shape_cast %121 : vector<2xf32> to vector<2x1xf32>
    %cst_50 = arith.constant dense<0.000000e+00> : vector<2x128xf32>
    %123 = tpu.matmul %114, %44, %cst_50 {dimension_numbers = #tpu.dot_dimension_numbers<[1], [0], [0], [1], [0, 0, 1, 1], [], []>} : vector<2x8xf32>, vector<8x128xf32>, vector<2x128xf32> -> vector<2x128xf32>
    %c8_i32_51 = arith.constant 8 : i32
    %124 = vector.broadcast %c8_i32_51 : i32 to vector<2x128xi32>
    %125 = arith.cmpi eq, %47, %124 : vector<2x128xi32>
    %126 = vector.shape_cast %122 : vector<2x1xf32> to vector<2x1xf32>
    %127 = vector.broadcast %126 : vector<2x1xf32> to vector<2x128xf32>
    %128 = arith.select %125, %127, %123 : vector<2x128xi1>, vector<2x128xf32>
    %c0_52 = arith.constant 0 : index
    %c0_53 = arith.constant 0 : index
    %c0_54 = arith.constant 0 : index
    %129 = vector.load %arg12[%c0_52, %c0_53, %c0_54] : memref<3x2x128xf32, #tpu.memory_space<vmem>>, vector<1x2x128xf32>
    %130 = vector.shape_cast %129 : vector<1x2x128xf32> to vector<2x128xf32>
    %131 = vector.shape_cast %128 : vector<2x128xf32> to vector<1x2x128xf32>
    tpu.vector_store %arg12[%c0_52, %c0_53, %c0_54], %131 {strides = array<i32>} : memref<3x2x128xf32, #tpu.memory_space<vmem>>, vector<1x2x128xf32>,
    %132 = vector.broadcast %122 : vector<2x1xf32> to vector<2x8xf32>
    %133 = arith.cmpf oeq, %46, %132 : vector<2x8xf32>
    %134 = arith.extui %133 : vector<2x8xi1> to vector<2x8xi32>
    %135 = arith.sitofp %134 : vector<2x8xi32> to vector<2x8xf32>
    %136 = arith.maximumf %48, %135 : vector<2x8xf32>
    %137 = vector.shape_cast %135 : vector<2x8xf32> to vector<2x1x8xf32>
    "tpu.trace_start"() <{level = 10 : i32, message = "bqn,bne->bqe"}> : () -> ()
    %cst_55 = arith.constant dense<0.000000e+00> : vector<2x1x64xf32>
    %138 = tpu.matmul %137, %13, %cst_55 {dimension_numbers = #tpu.dot_dimension_numbers<[2], [1], [1], [2], [0, 0, 0, 1, 1, 2], [0], [0]>} : vector<2x1x8xf32>, vector<2x8x64xf32>, vector<2x1x64xf32> -> vector<2x1x64xf32>
    "tpu.trace_stop"() : () -> ()
    %139 = vector.shape_cast %138 : vector<2x1x64xf32> to vector<2x64xf32>
    %c0_56 = arith.constant 0 : index
    %c0_57 = arith.constant 0 : index
    %140 = vector.load %arg7[%c0_56, %c0_57] : memref<64x64xf32, #tpu.memory_space<vmem>>, vector<64x64xf32>
    %cst_58 = arith.constant dense<0.000000e+00> : vector<2x64xf32>
    %141 = tpu.matmul %139, %140, %cst_58 {dimension_numbers = #tpu.dot_dimension_numbers<[1], [0], [0], [1], [0, 0, 1, 1], [], []>} : vector<2x64xf32>, vector<64x64xf32>, vector<2x64xf32> -> vector<2x64xf32>
    %c0_59 = arith.constant 0 : index
    %c0_60 = arith.constant 0 : index
    %142 = vector.load %arg8[%c0_59, %c0_60] : memref<64x64xf32, #tpu.memory_space<vmem>>, vector<64x64xf32>
    %cst_61 = arith.constant dense<0.000000e+00> : vector<2x64xf32>
    %143 = tpu.matmul %139, %142, %cst_61 {dimension_numbers = #tpu.dot_dimension_numbers<[1], [0], [0], [1], [0, 0, 1, 1], [], []>} : vector<2x64xf32>, vector<64x64xf32>, vector<2x64xf32> -> vector<2x64xf32>
    %144 = arith.addf %141, %143 : vector<2x64xf32>
    %145 = arith.addf %12, %144 : vector<2x64xf32>
    %146 = vector.shape_cast %145 : vector<2x64xf32> to vector<2x1x64xf32>
    %147 = vector.broadcast %146 : vector<2x1x64xf32> to vector<2x8x64xf32>
    %148 = arith.mulf %147, %3 : vector<2x8x64xf32>
    %149 = vector.shape_cast %148 : vector<2x8x64xf32> to vector<16x64xf32>
    %cst_62 = arith.constant dense<0.000000e+00> : vector<16x8xf32>
    %150 = tpu.matmul %149, %26, %cst_62 {dimension_numbers = #tpu.dot_dimension_numbers<[1], [0], [0], [1], [0, 0, 1, 1], [], []>} : vector<16x64xf32>, vector<64x8xf32>, vector<16x8xf32> -> vector<16x8xf32>
    %151 = vector.shape_cast %150 : vector<16x8xf32> to vector<2x8x8xf32>
    %cst_63 = arith.constant 0.353553385 : f32
    %152 = vector.broadcast %cst_63 : f32 to vector<2x8x8xf32>
    %153 = arith.mulf %151, %152 : vector<2x8x8xf32>
    %154 = vector.shape_cast %136 : vector<2x8xf32> to vector<2x8x1xf32>
    %cst_64 = arith.constant 0.000000e+00 : f32
    %155 = vector.broadcast %cst_64 : f32 to vector<2x8x1xf32>
    %156 = arith.cmpf ogt, %154, %155 : vector<2x8x1xf32>
    %cst_65 = arith.constant -1.000000e+09 : f32
    %157 = vector.shape_cast %156 : vector<2x8x1xi1> to vector<2x8x1xi1>
    %158 = vector.broadcast %157 : vector<2x8x1xi1> to vector<2x8x8xi1>
    %159 = vector.broadcast %cst_65 : f32 to vector<2x8x8xf32>
    %160 = arith.select %158, %159, %153 : vector<2x8x8xi1>, vector<2x8x8xf32>
    %cst_66 = arith.constant dense<0xFF800000> : vector<2x8xf32>
    %161 = vector.multi_reduction <maximumf>, %160, %cst_66 [1] : vector<2x8x8xf32> to vector<2x8xf32>
    %162 = vector.shape_cast %161 : vector<2x8xf32> to vector<2x1x8xf32>
    %163 = vector.broadcast %162 : vector<2x1x8xf32> to vector<2x8x8xf32>
    %164 = arith.subf %160, %163 : vector<2x8x8xf32>
    %165 = math.exp %164 : vector<2x8x8xf32>
    %cst_67 = arith.constant dense<0.000000e+00> : vector<2x8xf32>
    %166 = vector.multi_reduction <add>, %165, %cst_67 [1] : vector<2x8x8xf32> to vector<2x8xf32>
    %167 = vector.shape_cast %166 : vector<2x8xf32> to vector<2x1x8xf32>
    %168 = vector.broadcast %167 : vector<2x1x8xf32> to vector<2x8x8xf32>
    %169 = arith.divf %165, %168 : vector<2x8x8xf32>
    %170 = vector.shape_cast %169 : vector<2x8x8xf32> to vector<16x8xf32>
    %cst_68 = arith.constant dense<0.000000e+00> : vector<16x64xf32>
    %171 = tpu.matmul %170, %39, %cst_68 {dimension_numbers = #tpu.dot_dimension_numbers<[1], [0], [0], [1], [0, 0, 1, 1], [], []>} : vector<16x8xf32>, vector<8x64xf32>, vector<16x64xf32> -> vector<16x64xf32>
    %172 = vector.shape_cast %171 : vector<16x64xf32> to vector<2x8x64xf32>
    %173 = arith.mulf %172, %6 : vector<2x8x64xf32>
    %cst_69 = arith.constant dense<0.000000e+00> : vector<2x64xf32>
    %174 = vector.multi_reduction <add>, %173, %cst_69 [1] : vector<2x8x64xf32> to vector<2x64xf32>
    %c0_70 = arith.constant 0 : index
    %c0_71 = arith.constant 0 : index
    %175 = vector.load %arg9[%c0_70, %c0_71] : memref<64x64xf32, #tpu.memory_space<vmem>>, vector<64x64xf32>
    %cst_72 = arith.constant dense<0.000000e+00> : vector<2x64xf32>
    %176 = tpu.matmul %174, %175, %cst_72 {dimension_numbers = #tpu.dot_dimension_numbers<[1], [0], [0], [1], [0, 0, 1, 1], [], []>} : vector<2x64xf32>, vector<64x64xf32>, vector<2x64xf32> -> vector<2x64xf32>
    %177 = vector.shape_cast %176 : vector<2x64xf32> to vector<2x1x64xf32>
    "tpu.trace_start"() <{level = 10 : i32, message = "bqe,bne->bqn"}> : () -> ()
    %cst_73 = arith.constant dense<0.000000e+00> : vector<2x1x8xf32>
    %178 = tpu.matmul %177, %9, %cst_73 {dimension_numbers = #tpu.dot_dimension_numbers<[2], [2], [1], [1], [0, 0, 0, 1, 1, 1], [0], [0]>} : vector<2x1x64xf32>, vector<2x8x64xf32>, vector<2x1x8xf32> -> vector<2x1x8xf32>
    "tpu.trace_stop"() : () -> ()
    %179 = vector.shape_cast %178 : vector<2x1x8xf32> to vector<2x8xf32>
    %cst_74 = arith.constant 1.250000e-01 : f32
    %180 = vector.broadcast %cst_74 : f32 to vector<2x8xf32>
    %181 = arith.mulf %179, %180 : vector<2x8xf32>
    %182 = math.tanh %181 : vector<2x8xf32>
    %cst_75 = arith.constant 1.000000e+01 : f32
    %183 = vector.broadcast %cst_75 : f32 to vector<2x8xf32>
    %184 = arith.mulf %183, %182 : vector<2x8xf32>
    %cst_76 = arith.constant 0.000000e+00 : f32
    %185 = vector.broadcast %cst_76 : f32 to vector<2x8xf32>
    %186 = arith.cmpf ogt, %136, %185 : vector<2x8xf32>
    %cst_77 = arith.constant -1.000000e+09 : f32
    %187 = vector.broadcast %cst_77 : f32 to vector<2x8xf32>
    %188 = arith.select %186, %187, %184 : vector<2x8xi1>, vector<2x8xf32>
    %cst_78 = arith.constant dense<0xFF800000> : vector<2xf32>
    %189 = vector.multi_reduction <maximumf>, %188, %cst_78 [1] : vector<2x8xf32> to vector<2xf32>
    %190 = vector.shape_cast %189 : vector<2xf32> to vector<2x1xf32>
    %191 = vector.broadcast %190 : vector<2x1xf32> to vector<2x8xf32>
    %192 = arith.subf %188, %191 : vector<2x8xf32>
    %193 = math.exp %192 : vector<2x8xf32>
    %cst_79 = arith.constant dense<0.000000e+00> : vector<2xf32>
    %194 = vector.multi_reduction <add>, %193, %cst_79 [1] : vector<2x8xf32> to vector<2xf32>
    %195 = vector.shape_cast %194 : vector<2xf32> to vector<2x1xf32>
    %196 = math.log %195 : vector<2x1xf32>
    %197 = arith.addf %190, %196 : vector<2x1xf32>
    %198 = vector.broadcast %197 : vector<2x1xf32> to vector<2x8xf32>
    %199 = arith.subf %188, %198 : vector<2x8xf32>
    %cst_80 = arith.constant dense<0xFF800000> : vector<2xf32>
    %200 = vector.multi_reduction <maximumf>, %199, %cst_80 [1] : vector<2x8xf32> to vector<2xf32>
    %201 = vector.shape_cast %200 : vector<2xf32> to vector<2x1xf32>
    %202 = vector.broadcast %201 : vector<2x1xf32> to vector<2x8xf32>
    %203 = arith.cmpf oge, %199, %202 : vector<2x8xf32>
    %cst_81 = arith.constant 8.000000e+00 : f32
    %204 = vector.broadcast %cst_81 : f32 to vector<2x8xf32>
    %205 = arith.select %203, %46, %204 : vector<2x8xi1>, vector<2x8xf32>
    %cst_82 = arith.constant dense<0x7F800000> : vector<2xf32>
    %206 = vector.multi_reduction <minimumf>, %205, %cst_82 [1] : vector<2x8xf32> to vector<2xf32>
    %207 = vector.shape_cast %206 : vector<2xf32> to vector<2x1xf32>
    %cst_83 = arith.constant dense<0.000000e+00> : vector<2x128xf32>
    %208 = tpu.matmul %199, %44, %cst_83 {dimension_numbers = #tpu.dot_dimension_numbers<[1], [0], [0], [1], [0, 0, 1, 1], [], []>} : vector<2x8xf32>, vector<8x128xf32>, vector<2x128xf32> -> vector<2x128xf32>
    %c8_i32_84 = arith.constant 8 : i32
    %209 = vector.broadcast %c8_i32_84 : i32 to vector<2x128xi32>
    %210 = arith.cmpi eq, %47, %209 : vector<2x128xi32>
    %211 = vector.shape_cast %207 : vector<2x1xf32> to vector<2x1xf32>
    %212 = vector.broadcast %211 : vector<2x1xf32> to vector<2x128xf32>
    %213 = arith.select %210, %212, %208 : vector<2x128xi1>, vector<2x128xf32>
    %c1 = arith.constant 1 : index
    %c0_85 = arith.constant 0 : index
    %c0_86 = arith.constant 0 : index
    %214 = vector.load %arg12[%c1, %c0_85, %c0_86] : memref<3x2x128xf32, #tpu.memory_space<vmem>>, vector<1x2x128xf32>
    %215 = vector.shape_cast %214 : vector<1x2x128xf32> to vector<2x128xf32>
    %216 = vector.shape_cast %213 : vector<2x128xf32> to vector<1x2x128xf32>
    tpu.vector_store %arg12[%c1, %c0_85, %c0_86], %216 {strides = array<i32>} : memref<3x2x128xf32, #tpu.memory_space<vmem>>, vector<1x2x128xf32>,
    %217 = vector.broadcast %207 : vector<2x1xf32> to vector<2x8xf32>
    %218 = arith.cmpf oeq, %46, %217 : vector<2x8xf32>
    %219 = arith.extui %218 : vector<2x8xi1> to vector<2x8xi32>
    %220 = arith.sitofp %219 : vector<2x8xi32> to vector<2x8xf32>
    %221 = arith.maximumf %136, %220 : vector<2x8xf32>
    %222 = vector.shape_cast %220 : vector<2x8xf32> to vector<2x1x8xf32>
    "tpu.trace_start"() <{level = 10 : i32, message = "bqn,bne->bqe"}> : () -> ()
    %cst_87 = arith.constant dense<0.000000e+00> : vector<2x1x64xf32>
    %223 = tpu.matmul %222, %13, %cst_87 {dimension_numbers = #tpu.dot_dimension_numbers<[2], [1], [1], [2], [0, 0, 0, 1, 1, 2], [0], [0]>} : vector<2x1x8xf32>, vector<2x8x64xf32>, vector<2x1x64xf32> -> vector<2x1x64xf32>
    "tpu.trace_stop"() : () -> ()
    %224 = vector.shape_cast %223 : vector<2x1x64xf32> to vector<2x64xf32>
    %c0_88 = arith.constant 0 : index
    %c0_89 = arith.constant 0 : index
    %225 = vector.load %arg7[%c0_88, %c0_89] : memref<64x64xf32, #tpu.memory_space<vmem>>, vector<64x64xf32>
    %cst_90 = arith.constant dense<0.000000e+00> : vector<2x64xf32>
    %226 = tpu.matmul %139, %225, %cst_90 {dimension_numbers = #tpu.dot_dimension_numbers<[1], [0], [0], [1], [0, 0, 1, 1], [], []>} : vector<2x64xf32>, vector<64x64xf32>, vector<2x64xf32> -> vector<2x64xf32>
    %c0_91 = arith.constant 0 : index
    %c0_92 = arith.constant 0 : index
    %227 = vector.load %arg8[%c0_91, %c0_92] : memref<64x64xf32, #tpu.memory_space<vmem>>, vector<64x64xf32>
    %cst_93 = arith.constant dense<0.000000e+00> : vector<2x64xf32>
    %228 = tpu.matmul %224, %227, %cst_93 {dimension_numbers = #tpu.dot_dimension_numbers<[1], [0], [0], [1], [0, 0, 1, 1], [], []>} : vector<2x64xf32>, vector<64x64xf32>, vector<2x64xf32> -> vector<2x64xf32>
    %229 = arith.addf %226, %228 : vector<2x64xf32>
    %230 = arith.addf %12, %229 : vector<2x64xf32>
    %231 = vector.shape_cast %230 : vector<2x64xf32> to vector<2x1x64xf32>
    %232 = vector.broadcast %231 : vector<2x1x64xf32> to vector<2x8x64xf32>
    %233 = arith.mulf %232, %3 : vector<2x8x64xf32>
    %234 = vector.shape_cast %233 : vector<2x8x64xf32> to vector<16x64xf32>
    %cst_94 = arith.constant dense<0.000000e+00> : vector<16x8xf32>
    %235 = tpu.matmul %234, %26, %cst_94 {dimension_numbers = #tpu.dot_dimension_numbers<[1], [0], [0], [1], [0, 0, 1, 1], [], []>} : vector<16x64xf32>, vector<64x8xf32>, vector<16x8xf32> -> vector<16x8xf32>
    %236 = vector.shape_cast %235 : vector<16x8xf32> to vector<2x8x8xf32>
    %cst_95 = arith.constant 0.353553385 : f32
    %237 = vector.broadcast %cst_95 : f32 to vector<2x8x8xf32>
    %238 = arith.mulf %236, %237 : vector<2x8x8xf32>
    %239 = vector.shape_cast %221 : vector<2x8xf32> to vector<2x8x1xf32>
    %cst_96 = arith.constant 0.000000e+00 : f32
    %240 = vector.broadcast %cst_96 : f32 to vector<2x8x1xf32>
    %241 = arith.cmpf ogt, %239, %240 : vector<2x8x1xf32>
    %cst_97 = arith.constant -1.000000e+09 : f32
    %242 = vector.shape_cast %241 : vector<2x8x1xi1> to vector<2x8x1xi1>
    %243 = vector.broadcast %242 : vector<2x8x1xi1> to vector<2x8x8xi1>
    %244 = vector.broadcast %cst_97 : f32 to vector<2x8x8xf32>
    %245 = arith.select %243, %244, %238 : vector<2x8x8xi1>, vector<2x8x8xf32>
    %cst_98 = arith.constant dense<0xFF800000> : vector<2x8xf32>
    %246 = vector.multi_reduction <maximumf>, %245, %cst_98 [1] : vector<2x8x8xf32> to vector<2x8xf32>
    %247 = vector.shape_cast %246 : vector<2x8xf32> to vector<2x1x8xf32>
    %248 = vector.broadcast %247 : vector<2x1x8xf32> to vector<2x8x8xf32>
    %249 = arith.subf %245, %248 : vector<2x8x8xf32>
    %250 = math.exp %249 : vector<2x8x8xf32>
    %cst_99 = arith.constant dense<0.000000e+00> : vector<2x8xf32>
    %251 = vector.multi_reduction <add>, %250, %cst_99 [1] : vector<2x8x8xf32> to vector<2x8xf32>
    %252 = vector.shape_cast %251 : vector<2x8xf32> to vector<2x1x8xf32>
    %253 = vector.broadcast %252 : vector<2x1x8xf32> to vector<2x8x8xf32>
    %254 = arith.divf %250, %253 : vector<2x8x8xf32>
    %255 = vector.shape_cast %254 : vector<2x8x8xf32> to vector<16x8xf32>
    %cst_100 = arith.constant dense<0.000000e+00> : vector<16x64xf32>
    %256 = tpu.matmul %255, %39, %cst_100 {dimension_numbers = #tpu.dot_dimension_numbers<[1], [0], [0], [1], [0, 0, 1, 1], [], []>} : vector<16x8xf32>, vector<8x64xf32>, vector<16x64xf32> -> vector<16x64xf32>
    %257 = vector.shape_cast %256 : vector<16x64xf32> to vector<2x8x64xf32>
    %258 = arith.mulf %257, %6 : vector<2x8x64xf32>
    %cst_101 = arith.constant dense<0.000000e+00> : vector<2x64xf32>
    %259 = vector.multi_reduction <add>, %258, %cst_101 [1] : vector<2x8x64xf32> to vector<2x64xf32>
    %c0_102 = arith.constant 0 : index
    %c0_103 = arith.constant 0 : index
    %260 = vector.load %arg9[%c0_102, %c0_103] : memref<64x64xf32, #tpu.memory_space<vmem>>, vector<64x64xf32>
    %cst_104 = arith.constant dense<0.000000e+00> : vector<2x64xf32>
    %261 = tpu.matmul %259, %260, %cst_104 {dimension_numbers = #tpu.dot_dimension_numbers<[1], [0], [0], [1], [0, 0, 1, 1], [], []>} : vector<2x64xf32>, vector<64x64xf32>, vector<2x64xf32> -> vector<2x64xf32>
    %262 = vector.shape_cast %261 : vector<2x64xf32> to vector<2x1x64xf32>
    "tpu.trace_start"() <{level = 10 : i32, message = "bqe,bne->bqn"}> : () -> ()
    %cst_105 = arith.constant dense<0.000000e+00> : vector<2x1x8xf32>
    %263 = tpu.matmul %262, %9, %cst_105 {dimension_numbers = #tpu.dot_dimension_numbers<[2], [2], [1], [1], [0, 0, 0, 1, 1, 1], [0], [0]>} : vector<2x1x64xf32>, vector<2x8x64xf32>, vector<2x1x8xf32> -> vector<2x1x8xf32>
    "tpu.trace_stop"() : () -> ()
    %264 = vector.shape_cast %263 : vector<2x1x8xf32> to vector<2x8xf32>
    %cst_106 = arith.constant 1.250000e-01 : f32
    %265 = vector.broadcast %cst_106 : f32 to vector<2x8xf32>
    %266 = arith.mulf %264, %265 : vector<2x8xf32>
    %267 = math.tanh %266 : vector<2x8xf32>
    %cst_107 = arith.constant 1.000000e+01 : f32
    %268 = vector.broadcast %cst_107 : f32 to vector<2x8xf32>
    %269 = arith.mulf %268, %267 : vector<2x8xf32>
    %cst_108 = arith.constant 0.000000e+00 : f32
    %270 = vector.broadcast %cst_108 : f32 to vector<2x8xf32>
    %271 = arith.cmpf ogt, %221, %270 : vector<2x8xf32>
    %cst_109 = arith.constant -1.000000e+09 : f32
    %272 = vector.broadcast %cst_109 : f32 to vector<2x8xf32>
    %273 = arith.select %271, %272, %269 : vector<2x8xi1>, vector<2x8xf32>
    %cst_110 = arith.constant dense<0xFF800000> : vector<2xf32>
    %274 = vector.multi_reduction <maximumf>, %273, %cst_110 [1] : vector<2x8xf32> to vector<2xf32>
    %275 = vector.shape_cast %274 : vector<2xf32> to vector<2x1xf32>
    %276 = vector.broadcast %275 : vector<2x1xf32> to vector<2x8xf32>
    %277 = arith.subf %273, %276 : vector<2x8xf32>
    %278 = math.exp %277 : vector<2x8xf32>
    %cst_111 = arith.constant dense<0.000000e+00> : vector<2xf32>
    %279 = vector.multi_reduction <add>, %278, %cst_111 [1] : vector<2x8xf32> to vector<2xf32>
    %280 = vector.shape_cast %279 : vector<2xf32> to vector<2x1xf32>
    %281 = math.log %280 : vector<2x1xf32>
    %282 = arith.addf %275, %281 : vector<2x1xf32>
    %283 = vector.broadcast %282 : vector<2x1xf32> to vector<2x8xf32>
    %284 = arith.subf %273, %283 : vector<2x8xf32>
    %cst_112 = arith.constant dense<0xFF800000> : vector<2xf32>
    %285 = vector.multi_reduction <maximumf>, %284, %cst_112 [1] : vector<2x8xf32> to vector<2xf32>
    %286 = vector.shape_cast %285 : vector<2xf32> to vector<2x1xf32>
    %287 = vector.broadcast %286 : vector<2x1xf32> to vector<2x8xf32>
    %288 = arith.cmpf oge, %284, %287 : vector<2x8xf32>
    %cst_113 = arith.constant 8.000000e+00 : f32
    %289 = vector.broadcast %cst_113 : f32 to vector<2x8xf32>
    %290 = arith.select %288, %46, %289 : vector<2x8xi1>, vector<2x8xf32>
    %cst_114 = arith.constant dense<0x7F800000> : vector<2xf32>
    %291 = vector.multi_reduction <minimumf>, %290, %cst_114 [1] : vector<2x8xf32> to vector<2xf32>
    %292 = vector.shape_cast %291 : vector<2xf32> to vector<2x1xf32>
    %cst_115 = arith.constant dense<0.000000e+00> : vector<2x128xf32>
    %293 = tpu.matmul %284, %44, %cst_115 {dimension_numbers = #tpu.dot_dimension_numbers<[1], [0], [0], [1], [0, 0, 1, 1], [], []>} : vector<2x8xf32>, vector<8x128xf32>, vector<2x128xf32> -> vector<2x128xf32>
    %c8_i32_116 = arith.constant 8 : i32
    %294 = vector.broadcast %c8_i32_116 : i32 to vector<2x128xi32>
    %295 = arith.cmpi eq, %47, %294 : vector<2x128xi32>
    %296 = vector.shape_cast %292 : vector<2x1xf32> to vector<2x1xf32>
    %297 = vector.broadcast %296 : vector<2x1xf32> to vector<2x128xf32>
    %298 = arith.select %295, %297, %293 : vector<2x128xi1>, vector<2x128xf32>
    %c2 = arith.constant 2 : index
    %c0_117 = arith.constant 0 : index
    %c0_118 = arith.constant 0 : index
    %299 = vector.load %arg12[%c2, %c0_117, %c0_118] : memref<3x2x128xf32, #tpu.memory_space<vmem>>, vector<1x2x128xf32>
    %300 = vector.shape_cast %299 : vector<1x2x128xf32> to vector<2x128xf32>
    %301 = vector.shape_cast %298 : vector<2x128xf32> to vector<1x2x128xf32>
    tpu.vector_store %arg12[%c2, %c0_117, %c0_118], %301 {strides = array<i32>} : memref<3x2x128xf32, #tpu.memory_space<vmem>>, vector<1x2x128xf32>,
    return
  }
  func.func @transform_0(%arg0: i32) -> (i32, i32) {
    %c0_i32 = arith.constant 0 : i32
    %c0_i32_0 = arith.constant 0 : i32
    return %arg0, %c0_i32 : i32, i32
  }
  func.func @transform_1(%arg0: i32) -> (i32, i32) {
    %c0_i32 = arith.constant 0 : i32
    %c0_i32_0 = arith.constant 0 : i32
    return %arg0, %c0_i32 : i32, i32
  }
  func.func @transform_2(%arg0: i32) -> (i32, i32) {
    %c0_i32 = arith.constant 0 : i32
    %c0_i32_0 = arith.constant 0 : i32
    %c0_i32_1 = arith.constant 0 : i32
    return %c0_i32, %c0_i32_0 : i32, i32
  }
  func.func @transform_3(%arg0: i32) -> (i32, i32) {
    %c0_i32 = arith.constant 0 : i32
    %c0_i32_0 = arith.constant 0 : i32
    %c0_i32_1 = arith.constant 0 : i32
    return %c0_i32, %c0_i32_0 : i32, i32
  }
  func.func @transform_4(%arg0: i32) -> (i32, i32) {
    %c0_i32 = arith.constant 0 : i32
    %c0_i32_0 = arith.constant 0 : i32
    %c0_i32_1 = arith.constant 0 : i32
    return %c0_i32, %c0_i32_0 : i32, i32
  }
  func.func @transform_5(%arg0: i32) -> (i32, i32) {
    %c0_i32 = arith.constant 0 : i32
    %c0_i32_0 = arith.constant 0 : i32
    %c0_i32_1 = arith.constant 0 : i32
    return %c0_i32, %c0_i32_0 : i32, i32
  }
  func.func @transform_6(%arg0: i32) -> (i32, i32) {
    %c0_i32 = arith.constant 0 : i32
    %c0_i32_0 = arith.constant 0 : i32
    %c0_i32_1 = arith.constant 0 : i32
    return %c0_i32, %c0_i32_0 : i32, i32
  }
  func.func @transform_7(%arg0: i32) -> (i32, i32) {
    %c0_i32 = arith.constant 0 : i32
    %c0_i32_0 = arith.constant 0 : i32
    %c0_i32_1 = arith.constant 0 : i32
    return %c0_i32, %c0_i32_0 : i32, i32
  }
  func.func @transform_8(%arg0: i32) -> (i32, i32) {
    %c0_i32 = arith.constant 0 : i32
    %c0_i32_0 = arith.constant 0 : i32
    %c0_i32_1 = arith.constant 0 : i32
    return %c0_i32, %c0_i32_0 : i32, i32
  }
  func.func @transform_9(%arg0: i32) -> (i32, i32) {
    %c0_i32 = arith.constant 0 : i32
    %c0_i32_0 = arith.constant 0 : i32
    %c0_i32_1 = arith.constant 0 : i32
    return %c0_i32, %c0_i32_0 : i32, i32
  }
  func.func @transform_10(%arg0: i32) -> (i32, i32) {
    %c0_i32 = arith.constant 0 : i32
    %c0_i32_0 = arith.constant 0 : i32
    %c0_i32_1 = arith.constant 0 : i32
    return %c0_i32, %c0_i32_0 : i32, i32
  }
  func.func @transform_11(%arg0: i32) -> (i32, i32, i32) {
    %c0_i32 = arith.constant 0 : i32
    %c0_i32_0 = arith.constant 0 : i32
    %c0_i32_1 = arith.constant 0 : i32
    return %c0_i32, %arg0, %c0_i32_0 : i32, i32, i32
  }
}

</mosaic_0001>

<bundles_post_ra>
// kernel: tpu_custom_call.1
= control target key start
LH: loop header
LB: loop body
LE: loop exit
PB: predicated region body
PF: predicated region fallthrough
CT: control target
= control target key end

     0   :  { %16 = vsyncpa [#allocation3], 0  ;;  %s5256_s0 = inlined_call_operand.hbm [shape: f32[16,64], index: 0, kind: input, shape index: {}]   ;;  %s5257_s1 = inlined_call_operand.vmem [shape: f32[2,64], index: 1, kind: input, shape index: {}]   ;;  %s5258_s2 = inlined_call_operand.hbm [shape: f32[64,64], index: 2, kind: input, shape index: {}]   ;;  %s5259_s3 = inlined_call_operand.hbm [shape: f32[64,64], index: 3, kind: input, shape index: {}]   ;;  %s5260_s4 = inlined_call_operand.hbm [shape: f32[64,64], index: 4, kind: input, shape index: {}]   ;;  %s5261_s5 = inlined_call_operand.hbm [shape: f32[64,64], index: 5, kind: input, shape index: {}]   ;;  %s5262_s6 = inlined_call_operand.hbm [shape: f32[64,64], index: 6, kind: input, shape index: {}]   ;;  %s5263_s7 = inlined_call_operand.hbm [shape: f32[64,64], index: 7, kind: input, shape index: {}]   ;;  %s5264_s8 = inlined_call_operand.hbm [shape: f32[64,64], index: 8, kind: input, shape index: {}]   ;;  %s5265_s9 = inlined_call_operand.vmem [shape: f32[1,64], index: 9, kind: input, shape index: {}]   ;;  %s5266_s10 = inlined_call_operand.vmem [shape: f32[1,64], index: 10, kind: input, shape index: {}]   ;;  %s5267_s11 = inlined_call_operand.hbm [shape: f32[3,2,128], index: 11, kind: output, shape index: {}]  }
   0x1   :  { %17 = vsyncpa [#allocation6], 0 }
   0x2   :  { %18 = vsyncpa [#allocation9], 0 }
   0x3   :  { %19 = vsyncpa [#allocation12], 0 }
   0x4   :  { %20 = vsyncpa [#allocation15], 0 }
   0x5   :  { %21 = vsyncpa [#allocation4], 0  ;;  %s4502_s17 = smov [#allocation5]   ;;  %s4503_s19 = smov [#allocation8]  }
   0x6   :  { %s41_s18 = sshll.u32 %s4502_s17, 4  ;;  %s65_s20 = sshll.u32 %s4503_s19, 4  ;;  %s42_s18 = int_to_ptr.vmem [resolvable:$true] %s41_s18  ;;  %s4581_s20 = int_to_ptr.vmem [resolvable:$true] %s65_s20 }
   0x7   :  { %s4292_s23 = scalar_lea.hbm %s5258_s2, 1024 }
   0x8   :  { %p4293_p0 = scmp.ne.s32.totalorder %s5258_s2, %s4292_s23  ;;  %p4296_p1 = scmp.lt.u32.totalorder %s4292_s23, %s5258_s2 }
   0xa   :  { %p4298_p2 = pnand %p4296_p1, %p4293_p0 }
   0xc   :  { %4301 = shalt.err (!%p4298_p2)
}
   0xd   :  { %s4302_s28 = scalar_lea.vmem %s42_s18, 1024  ;;  %p4307_p4 = scmp.lt.s32.totalorder %s42_s18, %s42_s18 }
   0xe   :  { %p4303_p3 = scmp.ne.s32.totalorder %s42_s18, %s4302_s28  ;;  %p4308_p5 = scmp.lt.s32.totalorder %s4302_s28, %s4302_s28 }
  0x10   :  { %p4309_p6 = por %p4308_p5, %p4307_p4 }
  0x12   :  { %p4310_p7 = pnand %p4309_p6, %p4303_p3 }
  0x14   :  { %4313 = shalt.err (!%p4310_p7)
}
  0x15   :  { %s4504_s29 = smov 128   ;;  %s4505_s30 = smov 8  }
  0x16   :  { %47 = dma.hbm_to_vmem [thread:$0]  %s5258_s2, 1024, %s42_s18, [#allocation6], %s4504_s29, %s4504_s29, %s4505_s30  }
  0x17   :  { %s4314_s16 = scalar_lea.hbm %s5260_s4, 1024 }
  0x18   :  { %p4315_p8 = scmp.ne.s32.totalorder %s5260_s4, %s4314_s16  ;;  %p4318_p9 = scmp.lt.u32.totalorder %s4314_s16, %s5260_s4 }
  0x1a   :  { %p4320_p10 = pnand %p4318_p9, %p4315_p8 }
  0x1c   :  { %4323 = shalt.err (!%p4320_p10)
}
  0x1d   :  { %s4324_s23 = scalar_lea.vmem %s4581_s20, 1024  ;;  %p4329_p12 = scmp.lt.s32.totalorder %s4581_s20, %s4581_s20 }
  0x1e   :  { %p4325_p11 = scmp.ne.s32.totalorder %s4581_s20, %s4324_s23  ;;  %p4330_p13 = scmp.lt.s32.totalorder %s4324_s23, %s4324_s23 }
  0x20   :  { %p4331_p0 = por %p4330_p13, %p4329_p12 }
  0x22   :  { %p4332_p1 = pnand %p4331_p0, %p4325_p11 }
  0x24   :  { %4335 = shalt.err (!%p4332_p1)
}
  0x25   :  { %71 = dma.hbm_to_vmem [thread:$0]  %s5260_s4, 1024, %s4581_s20, [#allocation9], %s4504_s29, %s4504_s29, %s4505_s30  }
  0x26   :  { %s4506_s24 = smov [#allocation11]   ;;  %s4507_s26 = smov [#allocation2]  }
  0x27   :  { %s89_s25 = sshll.u32 %s4506_s24, 4  ;;  %s27_s27 = sshll.u32 %s4507_s26, 4  ;;  %s90_s25 = int_to_ptr.vmem [resolvable:$true] %s89_s25  ;;  %s4618_s27 = int_to_ptr.vmem [resolvable:$true] %s27_s27 }
  0x28   :  { %s4336_s13 = scalar_lea.hbm %s5262_s6, 1024 }
  0x29   :  { %p4337_p2 = scmp.ne.s32.totalorder %s5262_s6, %s4336_s13  ;;  %p4340_p3 = scmp.lt.u32.totalorder %s4336_s13, %s5262_s6 }
  0x2b   :  { %p4342_p4 = pnand %p4340_p3, %p4337_p2 }
  0x2d   :  { %4345 = shalt.err (!%p4342_p4)
}
  0x2e   :  { %s4346_s4 = scalar_lea.vmem %s90_s25, 1024  ;;  %p4351_p6 = scmp.lt.s32.totalorder %s90_s25, %s90_s25 }
  0x2f   :  { %p4347_p5 = scmp.ne.s32.totalorder %s90_s25, %s4346_s4  ;;  %p4352_p7 = scmp.lt.s32.totalorder %s4346_s4, %s4346_s4 }
  0x31   :  { %p4353_p8 = por %p4352_p7, %p4351_p6 }
  0x33   :  { %p4354_p9 = pnand %p4353_p8, %p4347_p5 }
  0x35   :  { %4357 = shalt.err (!%p4354_p9)
}
  0x36   :  { %95 = dma.hbm_to_vmem [thread:$0]  %s5262_s6, 1024, %s90_s25, [#allocation12], %s4504_s29, %s4504_s29, %s4505_s30  }
  0x37   :  { %s4358_s23 = scalar_lea.hbm %s5256_s0, 256 }
  0x38   :  { %p4359_p10 = scmp.ne.s32.totalorder %s5256_s0, %s4358_s23  ;;  %p4362_p11 = scmp.lt.u32.totalorder %s4358_s23, %s5256_s0 }
  0x3a   :  { %p4364_p12 = pnand %p4362_p11, %p4359_p10 }
  0x3c   :  { %4367 = shalt.err (!%p4364_p12)
}
  0x3d   :  { %s4368_s28 = scalar_lea.vmem %s4618_s27, 256  ;;  %p4373_p0 = scmp.lt.s32.totalorder %s4618_s27, %s4618_s27 }
  0x3e   :  { %p4369_p13 = scmp.ne.s32.totalorder %s4618_s27, %s4368_s28  ;;  %p4374_p1 = scmp.lt.s32.totalorder %s4368_s28, %s4368_s28 }
  0x40   :  { %p4375_p2 = por %p4374_p1, %p4373_p0 }
  0x42   :  { %p4376_p3 = pnand %p4375_p2, %p4369_p13 }
  0x44   :  { %4379 = shalt.err (!%p4376_p3)
}
  0x45   :  { %33 = dma.hbm_to_vmem [thread:$0]  %s5256_s0, 256, %s4618_s27, [#allocation3], %s4504_s29, %s4504_s29, %s4505_s30  }
  0x46   :  { %s4508_s12 = smov [#allocation7]   ;;  %s4509_s14 = smov [#allocation10]  }
  0x47   :  { %s53_s13 = sshll.u32 %s4508_s12, 4  ;;  %s77_s15 = sshll.u32 %s4509_s14, 4  ;;  %s54_s13 = int_to_ptr.vmem [resolvable:$true] %s53_s13  ;;  %s4655_s15 = int_to_ptr.vmem [resolvable:$true] %s77_s15 }
  0x48   :  { %s4380_s4 = scalar_lea.hbm %s5259_s3, 1024 }
  0x49   :  { %p4381_p4 = scmp.ne.s32.totalorder %s5259_s3, %s4380_s4  ;;  %p4384_p5 = scmp.lt.u32.totalorder %s4380_s4, %s5259_s3 }
  0x4b   :  { %p4386_p6 = pnand %p4384_p5, %p4381_p4 }
  0x4d   :  { %4389 = shalt.err (!%p4386_p6)
}
  0x4e   :  { %s4390_s0 = scalar_lea.vmem %s54_s13, 1024  ;;  %p4395_p8 = scmp.lt.s32.totalorder %s54_s13, %s54_s13 }
  0x4f   :  { %p4391_p7 = scmp.ne.s32.totalorder %s54_s13, %s4390_s0  ;;  %p4396_p9 = scmp.lt.s32.totalorder %s4390_s0, %s4390_s0 }
  0x51   :  { %p4397_p10 = por %p4396_p9, %p4395_p8 }
  0x53   :  { %p4398_p11 = pnand %p4397_p10, %p4391_p7 }
  0x55   :  { %4401 = shalt.err (!%p4398_p11)
}
  0x56   :  { %59 = dma.hbm_to_vmem [thread:$0]  %s5259_s3, 1024, %s54_s13, [#allocation6], %s4504_s29, %s4504_s29, %s4505_s30  }
  0x57   :  { %s4402_s24 = scalar_lea.hbm %s5261_s5, 1024 }
  0x58   :  { %p4403_p12 = scmp.ne.s32.totalorder %s5261_s5, %s4402_s24  ;;  %p4406_p13 = scmp.lt.u32.totalorder %s4402_s24, %s5261_s5 }
  0x5a   :  { %p4408_p0 = pnand %p4406_p13, %p4403_p12 }
  0x5c   :  { %4411 = shalt.err (!%p4408_p0)
}
  0x5d   :  { %s4412_s12 = scalar_lea.vmem %s4655_s15, 1024  ;;  %p4417_p2 = scmp.lt.s32.totalorder %s4655_s15, %s4655_s15 }
  0x5e   :  { %p4413_p1 = scmp.ne.s32.totalorder %s4655_s15, %s4412_s12  ;;  %p4418_p3 = scmp.lt.s32.totalorder %s4412_s12, %s4412_s12 }
  0x60   :  { %p4419_p4 = por %p4418_p3, %p4417_p2 }
  0x62   :  { %p4420_p5 = pnand %p4419_p4, %p4413_p1 }
  0x64   :  { %4423 = shalt.err (!%p4420_p5)
}
  0x65   :  { %83 = dma.hbm_to_vmem [thread:$0]  %s5261_s5, 1024, %s4655_s15, [#allocation9], %s4504_s29, %s4504_s29, %s4505_s30  }
  0x66   :  { %s4510_s14 = smov [#allocation13]   ;;  %s4511_s17 = smov [#allocation14]  }
  0x67   :  { %s101_s16 = sshll.u32 %s4510_s14, 4  ;;  %s113_s4 = sshll.u32 %s4511_s17, 4  ;;  %s102_s16 = int_to_ptr.vmem [resolvable:$true] %s101_s16  ;;  %s4692_s4 = int_to_ptr.vmem [resolvable:$true] %s113_s4 }
  0x68   :  { %s4424_s21 = scalar_lea.hbm %s5263_s7, 1024 }
  0x69   :  { %p4425_p6 = scmp.ne.s32.totalorder %s5263_s7, %s4424_s21  ;;  %p4428_p7 = scmp.lt.u32.totalorder %s4424_s21, %s5263_s7 }
  0x6b   :  { %p4430_p8 = pnand %p4428_p7, %p4425_p6 }
  0x6d   :  { %4433 = shalt.err (!%p4430_p8)
}
  0x6e   :  { %s4434_s5 = scalar_lea.vmem %s102_s16, 1024  ;;  %p4439_p10 = scmp.lt.s32.totalorder %s102_s16, %s102_s16 }
  0x6f   :  { %p4435_p9 = scmp.ne.s32.totalorder %s102_s16, %s4434_s5  ;;  %p4440_p11 = scmp.lt.s32.totalorder %s4434_s5, %s4434_s5 }
  0x71   :  { %p4441_p12 = por %p4440_p11, %p4439_p10 }
  0x73   :  { %p4442_p13 = pnand %p4441_p12, %p4435_p9 }
  0x75   :  { %4445 = shalt.err (!%p4442_p13)
}
  0x76   :  { %107 = dma.hbm_to_vmem [thread:$0]  %s5263_s7, 1024, %s102_s16, [#allocation12], %s4504_s29, %s4504_s29, %s4505_s30  }
  0x77   :  { %s4446_s26 = scalar_lea.hbm %s5264_s8, 1024 }
  0x78   :  { %p4447_p0 = scmp.ne.s32.totalorder %s5264_s8, %s4446_s26  ;;  %p4450_p1 = scmp.lt.u32.totalorder %s4446_s26, %s5264_s8 }
  0x7a   :  { %p4452_p2 = pnand %p4450_p1, %p4447_p0 }
  0x7c   :  { %4455 = shalt.err (!%p4452_p2)
}
  0x7d   :  { %s4456_s3 = scalar_lea.vmem %s4692_s4, 1024  ;;  %p4461_p4 = scmp.lt.s32.totalorder %s4692_s4, %s4692_s4 }
  0x7e   :  { %p4457_p3 = scmp.ne.s32.totalorder %s4692_s4, %s4456_s3  ;;  %p4462_p5 = scmp.lt.s32.totalorder %s4456_s3, %s4456_s3 }
  0x80   :  { %p4463_p6 = por %p4462_p5, %p4461_p4 }
  0x82   :  { %p4464_p7 = pnand %p4463_p6, %p4457_p3 }
  0x84   :  { %4467 = shalt.err (!%p4464_p7)
}
  0x85   :  { %119 = dma.hbm_to_vmem [thread:$0]  %s5264_s8, 1024, %s4692_s4, [#allocation15], %s4504_s29, %s4504_s29, %s4505_s30  }
  0x86   :  { %4490 = dma.done.wait [#allocation3], 256  }
  0x87   :  { %4491 = vsyncadd [#allocation3], 4294967040 }
  0x88   :  { %4492 = dma.done.wait [#allocation6], 2048  }
  0x89   :  { %4493 = vsyncadd [#allocation6], 4294965248 }
  0x8a   :  { %4494 = dma.done.wait [#allocation9], 2048  }
  0x8b   :  { %4495 = vsyncadd [#allocation9], 4294965248 }
  0x8c   :  { %4496 = dma.done.wait [#allocation12], 2048  }
  0x8d   :  { %4497 = vsyncadd [#allocation12], 4294965248 }
  0x8e   :  { %4498 = dma.done.wait [#allocation15], 1024  }
  0x8f   :  { %4499 = vsyncadd [#allocation15], 4294966272  ;;  %v150_v0 = vld [vmem:[#allocation5] sm:$0xff]  ;;  %v151_v1 = vld [vmem:[#allocation5 + $0x8] sm:$0xff]  ;;  %vm158_vm0 = vcmask 523264   ;;  %v4512_v36 = vmov 0.0|0.0  }
  0x90   :  { %v240_v2 = vld [vmem:[#allocation7] sm:$0xff]  ;;  %v4005_v3 = vpack.c.bf16 %v151_v1, %v150_v0  ;;  %v241_v4 = vld [vmem:[#allocation7 + $0x8] sm:$0xff]  ;;  %v152_v5 = vld [vmem:[#allocation5 + $0x10] sm:$0xff]  ;;  %vm4513_vm1 = vmmov 0   ;;  %v4514_v46 = vmov 0.0  }
  0x91   :  { %v153_v6 = vld [vmem:[#allocation5 + $0x18] sm:$0xff]  ;;  %v4021_v7 = vpack.c.bf16 %v241_v4, %v240_v2  ;;  %v242_v9 = vld [vmem:[#allocation7 + $0x10] sm:$0xff]  ;;  %v154_v11 = vld [vmem:[#allocation5 + $0x20] sm:$0xff] }
  0x92   :  { %v4009_v8 = vpack.c.bf16 %v153_v6, %v152_v5  ;;  %v243_v10 = vld [vmem:[#allocation7 + $0x18] sm:$0xff]  ;;  %4006 = vmatprep.subr.bf16.mxu0 %v4005_v3  ;;  %v155_v13 = vld [vmem:[#allocation5 + $0x28] sm:$0xff]  ;;  %v244_v14 = vld [vmem:[#allocation7 + $0x20] sm:$0xff] }
  0x93   :  { %v4025_v12 = vpack.c.bf16 %v243_v10, %v242_v9  ;;  %v245_v15 = vld [vmem:[#allocation7 + $0x28] sm:$0xff]  ;;  %4022 = vmatprep.subr.bf16.mxu1 %v4021_v7  ;;  %4008 = vmatpush3.bf16.msra.mxu0 %v4005_v3  ;;  %v4013_v16 = vpack.c.bf16 %v155_v13, %v154_v11  ;;  %v4729_v17 = vld [vmem:[#allocation2] sm:$0xff]  ;;  %v157_v20 = vld [vmem:[#allocation5 + $0x38] sm:$0xff] }
  0x94   :  { %4024 = vmatpush3.bf16.msra.mxu1 %v4021_v7  ;;  %4010 = vmatprep.subr.bf16.mxu0 %v4009_v8  ;;  %v4029_v18 = vpack.c.bf16 %v245_v15, %v244_v14  ;;  %v156_v19 = vld [vmem:[#allocation5 + $0x30] sm:$0xff]  ;;  %v247_v22 = vld [vmem:[#allocation7 + $0x38] sm:$0xff]  ;;  %v323_v25 = vld [vmem:[#allocation8] sm:$0xff]  ;;  %v488_v15 = vlaneseq }
  0x95   :  { %4026 = vmatprep.subr.bf16.mxu1 %v4025_v12  ;;  %3637 = vmatprep.mubr.msk.f32.mxu0 %vm158_vm0, %v4729_v17  ;;  %v246_v21 = vld [vmem:[#allocation7 + $0x30] sm:$0xff]  ;;  %v4017_v23 = vpack.c.bf16 %v157_v20, %v156_v19  ;;  %v324_v26 = vld [vmem:[#allocation8 + $0x8] sm:$0xff]  ;;  %v407_v28 = vld [vmem:[#allocation10] sm:$0xff] }
  0x96   :  { %3656 = vmatprep.mubr.msk.f32.mxu1 %vm158_vm0, %v4729_v17  ;;  %v4033_v24 = vpack.c.bf16 %v247_v22, %v246_v21  ;;  %v4037_v27 = vpack.c.bf16 %v324_v26, %v323_v25  ;;  %v408_v29 = vld [vmem:[#allocation10 + $0x8] sm:$0xff]  ;;  %v325_v30 = vld [vmem:[#allocation8 + $0x10] sm:$0xff]  ;;  %v326_v31 = vld [vmem:[#allocation8 + $0x18] sm:$0xff]  ;;  %v4515_v26 = vmov 1.0|1.0  }
  0x97   :  { %4012 = vmatpush3.bf16.msra.mxu0 %v4009_v8  ;;  %v4735_v32 = vld [vmem:[#allocation2 + $0x8] sm:$0xff]  ;;  %v4054_v33 = vpack.c.bf16 %v408_v29, %v407_v28  ;;  %v4041_v34 = vpack.c.bf16 %v326_v31, %v325_v30  ;;  %v409_v35 = vld [vmem:[#allocation10 + $0x10] sm:$0xff]  ;;  %v327_v38 = vld [vmem:[#allocation8 + $0x20] sm:$0xff] }
  0x98   :  { %4028 = vmatpush3.bf16.msra.mxu1 %v4025_v12  ;;  %4014 = vmatprep.subr.bf16.mxu0 %v4013_v16  ;;  %v410_v37 = vld [vmem:[#allocation10 + $0x18] sm:$0xff]  ;;  %v328_v39 = vld [vmem:[#allocation8 + $0x28] sm:$0xff]  ;;  %v411_v42 = vld [vmem:[#allocation10 + $0x20] sm:$0xff] }
  0x99   :  { %4030 = vmatprep.subr.bf16.mxu1 %v4029_v18  ;;  %v4057_v40 = vpack.c.bf16 %v410_v37, %v409_v35  ;;  %v4045_v41 = vpack.c.bf16 %v328_v39, %v327_v38  ;;  %v412_v43 = vld [vmem:[#allocation10 + $0x28] sm:$0xff]  ;;  %v329_v44 = vld [vmem:[#allocation8 + $0x30] sm:$0xff]  ;;  %v330_v45 = vld [vmem:[#allocation8 + $0x38] sm:$0xff] }
  0x9a   :  { %v4060_v47 = vpack.c.bf16 %v412_v43, %v411_v42  ;;  %v4049_v48 = vpack.c.bf16 %v330_v45, %v329_v44  ;;  %v413_v49 = vld [vmem:[#allocation10 + $0x30] sm:$0xff]  ;;  %v414_v50 = vld [vmem:[#allocation10 + $0x38] sm:$0xff]  ;;  %v574_v52 = vld [vmem:[#allocation13] sm:$0xff]  ;;  %v4516_v44 = vmov 1966171168  }
  0x9b   :  { %4016 = vmatpush3.bf16.msra.mxu0 %v4013_v16  ;;  %v4063_v51 = vpack.c.bf16 %v414_v50, %v413_v49  ;;  %v575_v53 = vld [vmem:[#allocation13 + $0x8] sm:$0xff]  ;;  %v566_v54 = vld [vmem:[#allocation11] sm:$0xff]  ;;  %v406_v57 = vld [vmem:[%s5257_s1] sm:$0x3]  ;;  %v4799_v16 = vand.u32 127, %v488_v15  ;;  %v729_v45 = vunpack.c.l.s4 %v4516_v44 }
  0x9c   :  { %4032 = vmatpush3.bf16.msra.mxu1 %v4029_v18  ;;  %4018 = vmatprep.subr.bf16.mxu0 %v4017_v23  ;;  %v567_v55 = vld [vmem:[#allocation11 + $0x8] sm:$0xff]  ;;  %v4749_v56 = vpack.c.bf16 %v575_v53, %v574_v52  ;;  %v576_v59 = vld [vmem:[#allocation13 + $0x10] sm:$0xff]  ;;  %v577_v60 = vld [vmem:[#allocation13 + $0x18] sm:$0xff]  ;;  %v4801_v18 = vshrl.u32 %v488_v15, 7 }
  0x9d   :  { %4034 = vmatprep.subr.bf16.mxu1 %v4033_v24  ;;  %v4755_v58 = vpack.c.bf16 %v567_v55, %v566_v54  ;;  %v568_v61 = vld [vmem:[#allocation11 + $0x10] sm:$0xff]  ;;  %v569_v62 = vld [vmem:[#allocation11 + $0x18] sm:$0xff]  ;;  %v4762_v63 = vpack.c.bf16 %v577_v60, %v576_v59  ;;  %v578_v1 = vld [vmem:[#allocation13 + $0x20] sm:$0xff]  ;;  %v499_v19 = vmul.u32 8, %v4799_v16  ;;  %v508_v20 = vadd.s32 1, %v4799_v16 }
  0x9e   :  { %v4766_v0 = vpack.c.bf16 %v569_v62, %v568_v61  ;;  %v579_v2 = vld [vmem:[#allocation13 + $0x28] sm:$0xff]  ;;  %v570_v3 = vld [vmem:[#allocation11 + $0x20] sm:$0xff]  ;;  %v580_v7 = vld [vmem:[#allocation13 + $0x30] sm:$0xff]  ;;  %v490_v21 = vadd.s32 8, %v4801_v18  ;;  %v491_v22 = vadd.s32 16, %v4801_v18  ;;  %v493_v28 = vadd.s32 32, %v4801_v18 }
  0x9f   :  { %4020 = vmatpush3.bf16.msra.mxu0 %v4017_v23  ;;  %v571_v4 = vld [vmem:[#allocation11 + $0x28] sm:$0xff]  ;;  %v4774_v5 = vpack.c.bf16 %v579_v2, %v578_v1  ;;  %v581_v8 = vld [vmem:[#allocation13 + $0x38] sm:$0xff]  ;;  %v572_v9 = vld [vmem:[#allocation11 + $0x30] sm:$0xff]  ;;  %vm500_vm2 = vcmp.ge.s32.totalorder %v4801_v18, %v499_v19  ;;  %v509_v23 = vmul.u32 8, %v508_v20  ;;  %v494_v29 = vadd.s32 40, %v4801_v18 }
  0xa0   :  { %4036 = vmatpush3.bf16.msra.mxu1 %v4033_v24  ;;  %4038 = vmatprep.subr.bf16.mxu0 %v4037_v27  ;;  %v4778_v6 = vpack.c.bf16 %v571_v4, %v570_v3  ;;  %v573_v10 = vld [vmem:[#allocation11 + $0x38] sm:$0xff]  ;;  %v4782_v11 = vpack.c.bf16 %v581_v8, %v580_v7  ;;  %v3363_v13 = vld [vmem:[%s5266_s10] ss:$0 sm:$0xff]  ;;  %v492_v24 = vadd.s32 24, %v4801_v18  ;;  %vm501_vm3 = vcmp.ge.s32.totalorder %v490_v21, %v499_v19 }
  0xa1   :  { %4053 = vmatprep.subr.bf16.mxu1 %v4512_v36  ;;  %v4786_v12 = vpack.c.bf16 %v573_v10, %v572_v9  ;;  %v3362_v14 = vld [vmem:[%s5265_s9] ss:$0 sm:$0xff]  ;;  %vm510_vm4 = vcmp.lt.s32.totalorder %v4801_v18, %v509_v23  ;;  %vm511_vm5 = vcmp.lt.s32.totalorder %v490_v21, %v509_v23  ;;  %vm502_vm7 = vcmp.ge.s32.totalorder %v491_v22, %v499_v19  ;;  %s4518_s9 = smov [#allocation16]  }
  0xa2   :  { %3638 = vmatmul.mubr.msk.f32.vlgmr.msra.gmra.mrb[0].mxu0 %vm158_vm0, %v4735_v32  ;;  %vm518_vm6 = vmand %vm500_vm2, %vm510_vm4  ;;  %vm512_vm8 = vcmp.lt.s32.totalorder %v491_v22, %v509_v23  ;;  %vm503_vm10 = vcmp.ge.s32.totalorder %v492_v24, %v499_v19  ;;  %vm513_vm11 = vcmp.lt.s32.totalorder %v492_v24, %v509_v23  ;;  %vm504_vm2 = vcmp.ge.s32.totalorder %v493_v28, %v499_v19  ;;  %s3329_s10 = sshll.u32 %s4518_s9, 4  ;;  %s3330_s10 = int_to_ptr.vmem [resolvable:$true] %s3329_s10 }
  0xa3   :  { %3657 = vmatmul.mubr.msk.f32.vlgmr.msra.gmra.mrb[0].mxu1 %vm158_vm0, %v4735_v32  ;;  %4040 = vmatpush3.bf16.msra.mxu0 %v4037_v27  ;;  %vm519_vm9 = vmand %vm501_vm3, %vm511_vm5  ;;  %vm505_vm3 = vcmp.ge.s32.totalorder %v494_v29, %v499_v19  ;;  %vm514_vm4 = vcmp.lt.s32.totalorder %v493_v28, %v509_v23  ;;  %vm515_vm5 = vcmp.lt.s32.totalorder %v494_v29, %v509_v23  ;;  %v495_v30 = vadd.s32 48, %v4801_v18  ;;  %s4468_s17 = scalar_lea.vmem %s3330_s10, 96  ;;  %p4473_p9 = scmp.lt.s32.totalorder %s3330_s10, %s3330_s10 }
  0xa4   :  { %4055 = vmatpush3.bf16.msra.mxu1 %v4054_v33  ;;  %4042 = vmatprep.subr.bf16.mxu0 %v4041_v34  ;;  %vm4810_vm12 = vmpackc.low %vm519_vm9, %vm518_vm6  ;;  %v496_v31 = vadd.s32 56, %v4801_v18  ;;  %v542_v4 = vmul.u32 8, %v4801_v18  ;;  %v544_v7 = vadd.s32 1, %v4801_v18  ;;  %v4517_v10 = vmov 1.0   ;;  %p4469_p8 = scmp.ne.s32.totalorder %s3330_s10, %s4468_s17  ;;  %p4474_p10 = scmp.lt.s32.totalorder %s4468_s17, %s4468_s17 }
  0xa5   :  { %4056 = vmatprep.subr.bf16.mxu1 %v4512_v36  ;;  %3675 = vmatprep.mubr.msk.f32.mxu0 %vm158_vm0, %v4729_v17  ;;  %vm520_vm13 = vmand %vm502_vm7, %vm512_vm8  ;;  %vm506_vm9 = vcmp.ge.s32.totalorder %v495_v30, %v499_v19 }
  0xa6   :  { %3694 = vmatprep.mubr.msk.f32.mxu1 %vm4513_vm1, %v4514_v46  ;;  %vm521_vm14 = vmand %vm503_vm10, %vm513_vm11  ;;  %vm507_vm10 = vcmp.ge.s32.totalorder %v496_v31, %v499_v19  ;;  %vm516_vm11 = vcmp.lt.s32.totalorder %v495_v30, %v509_v23  ;;  %v545_v8 = vmul.u32 8, %v544_v7  ;;  %p4475_p11 = por %p4474_p10, %p4473_p9 }
  0xa7   :  { %4044 = vmatpush3.bf16.msra.mxu0 %v4041_v34  ;;  %vm4820_vm15 = vmpackc.low %vm521_vm14, %vm520_vm13  ;;  %vm517_vm13 = vcmp.lt.s32.totalorder %v496_v31, %v509_v23 }
  0xa8   :  { %4058 = vmatpush3.bf16.msra.mxu1 %v4057_v40  ;;  %4046 = vmatprep.subr.bf16.mxu0 %v4045_v41  ;;  %vm522_vm6 = vmand %vm504_vm2, %vm514_vm4  ;;  %vm543_vm4 = vcmp.ge.s32.totalorder %v4799_v16, %v542_v4  ;;  %p4476_p12 = pnand %p4475_p11, %p4469_p8 }
  0xa9   :  { %4059 = vmatprep.subr.bf16.mxu1 %v4512_v36  ;;  %vm523_vm7 = vmand %vm505_vm3, %vm515_vm5  ;;  %vm546_vm5 = vcmp.lt.s32.totalorder %v4799_v16, %v545_v8 }
  0xaa   :  { %vm4834_vm8 = vmpackc.low %vm523_vm7, %vm522_vm6  ;;  %vm850_vm7 = vcmask 64512  }
  0xab   :  { %4048 = vmatpush3.bf16.msra.mxu0 %v4045_v41  ;;  %vm524_vm14 = vmand %vm506_vm9, %vm516_vm11  ;;  %vm996_vm9 = vcmask 1041409   ;;  %vm550_vm11 = vcmp.eq.s32.totalorder %v4801_v18, %v4799_v16 }
  0xac   :  { %4061 = vmatpush3.bf16.msra.mxu1 %v4060_v47  ;;  %4050 = vmatprep.subr.bf16.mxu0 %v4049_v48  ;;  %vm525_vm2 = vmand %vm507_vm10, %vm517_vm13  ;;  %v730_v47 = vunpack.c.0.s8 %v729_v45  ;;  %vm1256_vm10 = vcmask 58368  }
  0xad   :  { %4062 = vmatprep.subr.bf16.mxu1 %v4512_v36  ;;  %vm4844_vm3 = vmpackc.low %vm525_vm2, %vm524_vm14  ;;  %vm1383_vm2 = vcmp.eq.s32.totalorder %v4799_v16, 8 }
  0xae   :  { %vm4894_vm6 = vmand %vm543_vm4, %vm546_vm5 }
  0xaf   :  { %4052 = vmatpush3.bf16.msra.mxu0 %v4049_v48 }
  0xb0   :  { %4064 = vmatpush3.bf16.msra.mxu1 %v4063_v51  ;;  %4065 = vmatprep.subr.bf16.mxu0 %v4512_v36  ;;  %v4870_v51 = vsub.s32 %v730_v47, %v4801_v18 }
  0xb1   :  { %4077 = vmatprep.subr.bf16.mxu1 %v4512_v36 }
  0xb2   :  { %3676 = vmatmul.mubr.msk.f32.vlgmr.msra.gmra.mrb[2].mxu0 %vm158_vm0, %v4735_v32 }
  0xb3   :  { %3695 = vmatmul.mubr.msk.f32.vlgmr.msra.gmra.mrb[2].mxu1 %vm158_vm0, %v406_v57  ;;  %4067 = vmatpush3.bf16.msra.mxu0 %v4749_v56  ;;  %v4875_v57 = vsub.s32 0, %v4801_v18 }
  0xb4   :  { %4079 = vmatpush3.bf16.msra.mxu1 %v4755_v58  ;;  %4068 = vmatprep.subr.bf16.mxu0 %v4512_v36 }
  0xb5   :  { %4080 = vmatprep.subr.bf16.mxu1 %v4512_v36  ;;  %3713 = vmatprep.mubr.msk.f32.mxu0 %vm4513_vm1, %v4514_v46 }
  0xb6   :  { %3732 = vmatprep.mubr.msk.f32.mxu1 %vm4513_vm1, %v4514_v46 }
  0xb7   :  { %4070 = vmatpush3.bf16.msra.mxu0 %v4762_v63 }
  0xb8   :  { %4082 = vmatpush3.bf16.msra.mxu1 %v4766_v0  ;;  %4071 = vmatprep.subr.bf16.mxu0 %v4512_v36 }
  0xb9   :  { %4083 = vmatprep.subr.bf16.mxu1 %v4512_v36 }
  0xbb   :  { %4073 = vmatpush3.bf16.msra.mxu0 %v4774_v5 }
  0xbc   :  { %4085 = vmatpush3.bf16.msra.mxu1 %v4778_v6  ;;  %4074 = vmatprep.subr.bf16.mxu0 %v4512_v36 }
  0xbd   :  { %4086 = vmatprep.subr.bf16.mxu1 %v4512_v36 }
  0xbf   :  { %4076 = vmatpush3.bf16.msra.mxu0 %v4782_v11 }
  0xc0   :  { %4088 = vmatpush3.bf16.msra.mxu1 %v4786_v12  ;;  %4090 = vmatprep.subr.msk.bf16.mxu0 %vm4810_vm12, %v4515_v26 }
  0xc1   :  { %3754 = vmatprep.subr.msk.mxu1 %vm4894_vm6, %v4517_v10 }
  0xc2   :  { %3714 = vmatmul.mubr.msk.f32.vlgmr.msra.gmra.mrb[4].mxu0 %vm158_vm0, %v3363_v13 }
  0xc3   :  { %3733 = vmatmul.mubr.msk.f32.vlgmr.msra.gmra.mrb[4].mxu1 %vm158_vm0, %v3362_v14  ;;  %4092 = vmatpush3.bf16.msk.msra.mxu0 %vm4810_vm12, %v4515_v26 }
  0xc4   :  { %4094 = vmatprep.subr.msk.bf16.mxu0 %vm4820_vm15, %v4515_v26  ;;  %3755 = vmatpush3.msk.msra.mxu1 %vm4894_vm6, %v4517_v10 }
  0xc5   :  { %4105 = vmatprep.subr.bf16.mxu1 %v4512_v36 }
  0xc7   :  { %4096 = vmatpush3.bf16.msk.msra.mxu0 %vm4820_vm15, %v4515_v26 }
  0xc8   :  { %4098 = vmatprep.subr.msk.bf16.mxu0 %vm4834_vm8, %v4515_v26 }
  0xcb   :  { %4100 = vmatpush3.bf16.msk.msra.mxu0 %vm4834_vm8, %v4515_v26 }
  0xcc   :  { %4102 = vmatprep.subr.msk.bf16.mxu0 %vm4844_vm3, %v4515_v26 }
  0xcf   :  { %4104 = vmatpush3.bf16.msk.msra.mxu0 %vm4844_vm3, %v4515_v26 }
  0xd0   :  { %3778 = vmatprep.subr.mxu0 %v4514_v46 }
 0x175   :  { %v4855_v35 = vpop.f32.mrb[0].mxu0 }
 0x176   :  { %v4857_v37 = vpop.f32.mrb[0].mxu1  ;;  %v4859_v38 = vpop.f32.mrb[1].mxu0 }
 0x177   :  { %v4861_v39 = vpop.f32.mrb[1].mxu1 }
 0x185   :  { %v4863_v40 = vpop.f32.mrb[2].mxu0 }
 0x186   :  { %v4865_v41 = vpop.f32.mrb[2].mxu1  ;;  %v4867_v42 = vpop.f32.mrb[3].mxu0 }
 0x187   :  { %v3696_v43 = vpop.f32.mrb[3].mxu1 }
 0x195   :  { %v650_v48 = vpop.f32.mrb[4].mxu0 }
 0x196   :  { %v722_v49 = vpop.f32.mrb[4].mxu1  ;;  %v3715_v50 = vpop.f32.mrb[5].mxu0 }
 0x197   :  { %v723_v52 = vadd.f32 %v722_v49, %v650_v48  ;;  %v3734_v53 = vpop.f32.mrb[5].mxu1 }
 0x199   :  { %v726_v54 = vadd.f32 %v723_v52, %v4865_v41 }
 0x19b   :  { %v734_v55 = vrot.slane %v726_v54, %v4870_v51 }
 0x19d   :  { %v735_v59 = vcombine.high %v734_v55, %v734_v55  ;;  %v742_v60 = vrot.slane %v734_v55, %v4870_v51 }
 0x19f   :  { %v749_v61 = vrot.slane %v735_v59, %v4870_v51  ;;  %v753_v62 = vrot.slane %v742_v60, %v4875_v57 }
 0x1a1   :  { %v757_v1 = vrot.slane %v749_v61, %v4875_v57  ;;  %v760_v2 = vmul.f32 %v753_v62, %v4859_v38 }
 0x1a3   :  { %3751 = vmatprep.mubr.msk.f32.mxu0 %vm158_vm0, %v760_v2  ;;  %v761_v3 = vmul.f32 %v4855_v35, %v757_v1 }
 0x1a5   :  { %3752 = vmatmul.mubr.msk.f32.vlgmr.msra.gmra.mrb[6].mxu0 %vm158_vm0, %v761_v3 }
 0x1a6   :  { %3779 = vmatpush3.xpose.msk.msra.mxu0 %vm158_vm0, %v4867_v42  ;;  %3780 = vmatprep.mubr.msk.f32.mxu0 %vm4513_vm1, %v4514_v46 }
 0x1a7   :  { %3783 = vmatprep.subr.mxu0 %v4514_v46 }
 0x278   :  { %v3753_v13 = vpop.f32.mrb[6].mxu0 }
 0x279   :  { %v844_v14 = vmul.f32 0.35355338, %v3753_v13  ;;  %v834_v15 = vpop.f32.mrb[7].mxu0 }
 0x27a   :  { %v843_v19 = vmul.f32 0.35355338, %v834_v15 }
 0x27b   :  { %v858_v20 = vsel %vm850_vm7, %v844_v14, -inf }
 0x27c   :  { %v859_v21 = vrot.slane %v858_v20, 4  ;;  %v851_v22 = vsel %vm850_vm7, %v843_v19, -inf }
 0x27d   :  { %v852_v23 = vrot.slane %v851_v22, 4 }
 0x27e   :  { %v860_v24 = vmax.f32 %v858_v20, %v859_v21 }
 0x27f   :  { %v853_v28 = vmax.f32 %v851_v22, %v852_v23 }
 0x280   :  { %v861_v29 = vrot.slane %v860_v24, 2 }
 0x281   :  { %v854_v30 = vrot.slane %v853_v28, 2 }
 0x282   :  { %v862_v31 = vmax.f32 %v860_v24, %v861_v29  ;;  %v986_v24 = vld [vmem:[#allocation14] sm:$0xff] }
 0x283   :  { %v855_v43 = vmax.f32 %v853_v28, %v854_v30  ;;  %v987_v28 = vld [vmem:[#allocation14 + $0x8] sm:$0xff]  ;;  %v988_v30 = vld [vmem:[#allocation14 + $0x10] sm:$0xff] }
 0x284   :  { %v863_v44 = vrot.slane %v862_v31, 1  ;;  %v4913_v29 = vpack.c.bf16 %v987_v28, %v986_v24 }
 0x285   :  { %v856_v45 = vrot.slane %v855_v43, 1 }
 0x286   :  { %v864_v47 = vmax.f32 %v862_v31, %v863_v44  ;;  %v989_v31 = vld [vmem:[#allocation14 + $0x18] sm:$0xff]  ;;  %v990_v44 = vld [vmem:[#allocation14 + $0x20] sm:$0xff] }
 0x287   :  { %v857_v48 = vmax.f32 %v855_v43, %v856_v45  ;;  %v4917_v43 = vpack.c.bf16 %v989_v31, %v988_v30  ;;  %v991_v45 = vld [vmem:[#allocation14 + $0x28] sm:$0xff] }
 0x288   :  { %v866_v49 = vsub.f32 %v844_v14, %v864_v47  ;;  %v4921_v47 = vpack.c.bf16 %v991_v45, %v990_v44 }
 0x289   :  { %v865_v50 = vsub.f32 %v843_v19, %v857_v48  ;;  %v992_v48 = vld [vmem:[#allocation14 + $0x30] sm:$0xff] }
 0x28a   :  { %v869_v52 = vmul.f32 1.442695, %v866_v49  ;;  %v993_v49 = vld [vmem:[#allocation14 + $0x38] sm:$0xff] }
 0x28b   :  { %v867_v53 = vmul.f32 1.442695, %v865_v50  ;;  %v4925_v50 = vpack.c.bf16 %v993_v49, %v992_v48 }
 0x28c   :  { %4240 = vpow2.f32 %v869_v52 }
 0x28d   :  { %4242 = vpow2.f32 %v867_v53 }
 0x296   :  { %v4241_v54 = vpop.eup %4240 }
 0x297   :  { %v4243_v55 = vpop.eup %4242  ;;  %v878_v59 = vsel %vm850_vm7, %v4241_v54, 0.0 }
 0x298   :  { %v879_v60 = vrot.slane %v878_v59, 4  ;;  %v871_v61 = vsel %vm850_vm7, %v4243_v55, 0.0 }
 0x299   :  { %v872_v62 = vrot.slane %v871_v61, 4 }
 0x29a   :  { %v880_v1 = vadd.f32 %v879_v60, %v878_v59 }
 0x29b   :  { %v873_v2 = vadd.f32 %v872_v62, %v871_v61 }
 0x29c   :  { %v881_v3 = vrot.slane %v880_v1, 2 }
 0x29d   :  { %v874_v4 = vrot.slane %v873_v2, 2 }
 0x29e   :  { %v882_v7 = vadd.f32 %v881_v3, %v880_v1 }
 0x29f   :  { %v875_v8 = vadd.f32 %v874_v4, %v873_v2 }
 0x2a0   :  { %v883_v13 = vrot.slane %v882_v7, 1 }
 0x2a1   :  { %v876_v14 = vrot.slane %v875_v8, 1 }
 0x2a2   :  { %v884_v15 = vadd.f32 %v883_v13, %v882_v7 }
 0x2a3   :  { %v877_v19 = vadd.f32 %v876_v14, %v875_v8 }
 0x2a4   :  { %4244 = vrcp.f32 %v884_v15 }
 0x2a5   :  { %4246 = vrcp.f32 %v877_v19 }
 0x2ae   :  { %v4245_v20 = vpop.eup %4244 }
 0x2af   :  { %v4247_v21 = vpop.eup %4246  ;;  %v888_v23 = vmul.f32 %v4245_v20, %v4241_v54 }
 0x2b0   :  { %v886_v22 = vmul.f32 %v4247_v21, %v4243_v55 }
 0x2b2   :  { %3756 = vmatprep.mubr.msk.f32.mxu1 %vm850_vm7, %v886_v22 }
 0x2b3   :  { %3757 = vmatmul.mubr.msk.f32.vlgmr.msra.gmra.mrb[6].mxu1 %vm850_vm7, %v888_v23 }
 0x2b4   :  { %3775 = vmatprep.mubr.msk.f32.mxu1 %vm4513_vm1, %v4514_v46  ;;  %4107 = vmatpush3.bf16.msra.mxu1 %v4913_v29 }
 0x2b5   :  { %4108 = vmatprep.subr.bf16.mxu1 %v4512_v36 }
 0x2b8   :  { %4110 = vmatpush3.bf16.msra.mxu1 %v4917_v43 }
 0x2b9   :  { %4111 = vmatprep.subr.bf16.mxu1 %v4512_v36 }
 0x2bc   :  { %4113 = vmatpush3.bf16.msra.mxu1 %v4921_v47 }
 0x2bd   :  { %4114 = vmatprep.subr.bf16.mxu1 %v4512_v36 }
 0x2c0   :  { %4116 = vmatpush3.bf16.msra.mxu1 %v4925_v50 }
 0x2c1   :  { %3788 = vmatprep.subr.mxu1 %v4514_v46 }
 0x386   :  { %v3758_v52 = vpop.f32.mrb[6].mxu1 }
 0x387   :  { %v971_v53 = vmul.f32 %v3758_v52, %v4857_v37  ;;  %v961_v54 = vpop.f32.mrb[7].mxu1 }
 0x388   :  { %v970_v55 = vmul.f32 %v961_v54, %v4861_v39 }
 0x389   :  { %v979_v59 = vsel %vm158_vm0, %v971_v53, 0.0 }
 0x38a   :  { %v980_v60 = vrot.slane %v979_v59, 4  ;;  %v972_v61 = vsel %vm158_vm0, %v970_v55, 0.0 }
 0x38b   :  { %v973_v62 = vrot.slane %v972_v61, 4 }
 0x38c   :  { %v981_v1 = vadd.f32 %v980_v60, %v979_v59 }
 0x38d   :  { %v974_v2 = vadd.f32 %v973_v62, %v972_v61 }
 0x38e   :  { %v982_v3 = vrot.slane %v981_v1, 2 }
 0x38f   :  { %v975_v4 = vrot.slane %v974_v2, 2 }
 0x390   :  { %v983_v7 = vadd.f32 %v982_v3, %v981_v1 }
 0x391   :  { %v976_v8 = vadd.f32 %v975_v4, %v974_v2 }
 0x392   :  { %v984_v13 = vrot.slane %v983_v7, 1 }
 0x393   :  { %v977_v14 = vrot.slane %v976_v8, 1 }
 0x394   :  { %v985_v15 = vadd.f32 %v984_v13, %v983_v7 }
 0x395   :  { %v978_v19 = vadd.f32 %v977_v14, %v976_v8 }
 0x397   :  { %v997_v20 = vsel %vm996_vm9, %v985_v15, %v978_v19 }
 0x398   :  { %3776 = vmatmul.mubr.msk.f32.vlgmr.msra.gmra.mrb[8].mxu1 %vm158_vm0, %v997_v20 }
 0x399   :  { %3790 = vmatprep.mubr.msk.f32.mxu1 %vm4513_vm1, %v4514_v46  ;;  %3789 = vmatpush3.msk.msra.mxu1 %vm550_vm11, %v4517_v10 }
 0x39a   :  { %3798 = vmatprep.subr.mxu1 %v4514_v46 }
 0x46b   :  { %v1066_v21 = vpop.f32.mrb[8].mxu1 }
 0x46c   :  { %v1077_v22 = vrot.slane %v1066_v21, %v4870_v51  ;;  %v3777_v23 = vpop.f32.mrb[9].mxu1 }
 0x46e   :  { %v1078_v24 = vcombine.high %v1077_v22, %v1077_v22  ;;  %v1085_v28 = vrot.slane %v1077_v22, %v4870_v51 }
 0x470   :  { %3781 = vmatmul.mubr.msk.f32.vlgmr.msra.gmra.mrb[8].mxu0 %vm158_vm0, %v1085_v28  ;;  %v1092_v30 = vrot.slane %v1078_v24, %v4870_v51 }
 0x471   :  { %3784 = vmatpush3.xpose.msk.msra.mxu0 %vm158_vm0, %v4863_v40  ;;  %3785 = vmatprep.mubr.msk.f32.mxu0 %vm4513_vm1, %v4514_v46 }
 0x472   :  { %3793 = vmatprep.subr.mxu0 %v4514_v46 }
 0x474   :  { %3786 = vmatmul.mubr.msk.f32.vlgmr.msra.gmra.mrb[10].mxu0 %vm158_vm0, %v1092_v30 }
 0x475   :  { %3794 = vmatpush3.msra.mxu0 %v4729_v17  ;;  %3795 = vmatprep.mubr.msk.f32.mxu0 %vm4513_vm1, %v4514_v46 }
 0x476   :  { %4117 = vmatprep.subr.bf16.mxu0 %v4512_v36 }
 0x543   :  { %v1164_v31 = vpop.f32.mrb[8].mxu0 }
 0x544   :  { %v3782_v44 = vpop.f32.mrb[9].mxu0  ;;  %v1243_v45 = vmul.f32 0.125, %v1164_v31 }
 0x546   :  { %4248 = vtanh.f32 %v1243_v45 }
 0x547   :  { %v1239_v48 = vpop.f32.mrb[10].mxu0 }
 0x548   :  { %v1244_v49 = vmul.f32 0.125, %v1239_v48  ;;  %v3787_v52 = vpop.f32.mrb[11].mxu0 }
 0x549   :  { %v4970_v52 = vcvt.s32.f32 %v4799_v16 }
 0x54a   :  { %4250 = vtanh.f32 %v1244_v49 }
 0x550   :  { %v4249_v53 = vpop.eup %4248 }
 0x551   :  { %v1247_v59 = vmul.f32 10.0, %v4249_v53 }
 0x554   :  { %v4251_v54 = vpop.eup %4250 }
 0x555   :  { %v1248_v55 = vmul.f32 10.0, %v4251_v54 }
 0x557   :  { %v1253_v60 = vrot.slane %v1248_v55, 7 }
 0x559   :  { %v1254_v17 = vsel %vm996_vm9, %v1253_v60, %v1247_v59 }
 0x55a   :  { %v1257_v61 = vsel %vm1256_vm10, %v1254_v17, -inf }
 0x55b   :  { %1258 = vmax.xlane.f32.xlu0 %v1257_v61 }
 0x5e8   :  { %v1259_v62 = vpop.xlane.xlu0 %1258 }
 0x5e9   :  { %v1261_v1 = vrot.slane %v1259_v62, 1  ;;  %v1264_v2 = vsub.f32 %v1247_v59, %v1259_v62 }
 0x5eb   :  { %v1265_v3 = vsub.f32 %v1248_v55, %v1261_v1  ;;  %v1266_v4 = vmul.f32 1.442695, %v1264_v2  ;;  %v1847_v1 = vsub.s32 1, %v4801_v18 }
 0x5ed   :  { %v1268_v7 = vmul.f32 1.442695, %v1265_v3 }
 0x5ef   :  { %4252 = vpow2.f32 %v1268_v7 }
 0x5f0   :  { %4254 = vpow2.f32 %v1266_v4 }
 0x5f9   :  { %v4253_v8 = vpop.eup %4252 }
 0x5fa   :  { %v1272_v13 = vrot.slane %v4253_v8, 7  ;;  %v4255_v14 = vpop.eup %4254 }
 0x5fc   :  { %v1273_v15 = vsel %vm996_vm9, %v1272_v13, %v4255_v14 }
 0x5fd   :  { %v1275_v19 = vsel %vm1256_vm10, %v1273_v15, 0.0 }
 0x5fe   :  { %1276 = vadd.xlane.f32.xlu0 %v1275_v19 }
 0x68b   :  { %v1277_v20 = vpop.xlane.xlu0 %1276 }
 0x68c   :  { %4256 = vlog2.f32 %v1277_v20 }
 0x696   :  { %v4257_v21 = vpop.eup %4256 }
 0x697   :  { %v1279_v22 = vmul.f32 0.6931472, %v4257_v21 }
 0x699   :  { %v1280_v23 = vadd.f32 %v1279_v22, %v1259_v62 }
 0x69b   :  { %v1282_v24 = vrot.slane %v1280_v23, 1  ;;  %v1285_v30 = vsub.f32 %v1247_v59, %v1280_v23 }
 0x69d   :  { %v1286_v28 = vsub.f32 %v1248_v55, %v1282_v24 }
 0x69f   :  { %v1289_v31 = vrot.slane %v1286_v28, 7 }
 0x6a1   :  { %v1290_v44 = vsel %vm996_vm9, %v1289_v31, %v1285_v30 }
 0x6a2   :  { %3791 = vmatmul.mubr.msk.f32.vlgmr.msra.gmra.mrb[10].mxu1 %vm850_vm7, %v1290_v44  ;;  %v1292_v45 = vsel %vm1256_vm10, %v1290_v44, -inf }
 0x6a3   :  { %1293 = vmax.xlane.f32.xlu1 %v1292_v45  ;;  %3799 = vmatpush3.msra.mxu1 %v4735_v32 }
 0x6a4   :  { %3800 = vmatprep.mubr.msk.f32.mxu1 %vm4513_vm1, %v4514_v46  ;;  %4129 = vmatprep.subr.bf16.mxu1 %v4512_v36 }
 0x730   :  { %v1294_v48 = vpop.xlane.xlu1 %1293 }
 0x731   :  { %v1296_v49 = vrot.slane %v1294_v48, 1  ;;  %vm1299_vm13 = vcmp.ge.f32.partialorder %v1285_v30, %v1294_v48 }
 0x732   :  { %v1301_v55 = vsel %vm1299_vm13, %v4970_v52, 8.0 }
 0x733   :  { %vm1300_vm14 = vcmp.ge.f32.partialorder %v1286_v28, %v1296_v49 }
 0x734   :  { %v1302_v53 = vsel %vm1300_vm14, %v4970_v52, 8.0 }
 0x735   :  { %v1305_v54 = vrot.slane %v1302_v53, 7 }
 0x737   :  { %v1306_v59 = vsel %vm996_vm9, %v1305_v54, %v1301_v55 }
 0x738   :  { %v1308_v32 = vsel %vm1256_vm10, %v1306_v59, inf }
 0x739   :  { %1309 = vmin.xlane.f32.xlu1 %v1308_v32 }
 0x775   :  { %v1379_v60 = vpop.f32.mrb[10].mxu1 }
 0x776   :  { %v3792_v17 = vpop.f32.mrb[11].mxu1 }
 0x7c6   :  { %v1310_v61 = vpop.xlane.xlu1 %1309 }
 0x7c7   :  { %v1384_v62 = vsel %vm1383_vm2, %v1310_v61, %v1379_v60  ;;  %vm1386_vm4 = vcmp.eq.f32.partialorder %v4970_v52, %v1310_v61 }
 0x7c8   :  { %1385 = vst [vmem:[#allocation16] sm:$0x3] %v1384_v62  ;;  %v3386_v2 = vsel %vm1386_vm4, 1.0, %v4514_v46 }
 0x7c9   :  { %v4982_v3 = vmax.f32 %v3386_v2, 0.0  ;;  %v1397_v4 = vrot.slane %v3386_v2, %v4870_v51 }
 0x7cb   :  { %v1398_v7 = vcombine.high %v1397_v4, %v1397_v4  ;;  %v1405_v8 = vrot.slane %v1397_v4, %v4870_v51  ;;  %v1848_v13 = vrot.slane %v4982_v3, %v1847_v1  ;;  %v1841_v14 = vrot.slane %v4982_v3, %v4875_v57 }
 0x7cc   :  { %vm2251_vm14 = vcmp.gt.f32.partialorder %v4982_v3, 0.0 }
 0x7cd   :  { %v1412_v15 = vrot.slane %v1398_v7, %v4870_v51  ;;  %3796 = vmatmul.mubr.msk.f32.vlgmr.msra.gmra.mrb[12].mxu0 %vm850_vm7, %v1405_v8  ;;  %1850 = vbcast.lane.b32.xlu1 %v1848_v13, 256 }
 0x7ce   :  { %1843 = vbcast.lane.b32.xlu0 %v1841_v14, 256  ;;  %4119 = vmatpush3.bf16.msra.mxu0 %v4749_v56 }
 0x7cf   :  { %3801 = vmatmul.mubr.msk.f32.vlgmr.msra.gmra.mrb[12].mxu1 %vm850_vm7, %v1412_v15  ;;  %4120 = vmatprep.subr.bf16.mxu0 %v4512_v36 }
 0x7d0   :  { %4131 = vmatpush3.bf16.msra.mxu1 %v4755_v58  ;;  %3819 = vmatprep.mubr.msk.f32.mxu0 %vm4513_vm1, %v4514_v46 }
 0x7d1   :  { %4132 = vmatprep.subr.bf16.mxu1 %v4512_v36  ;;  %3838 = vmatprep.mubr.msk.f32.mxu1 %vm4513_vm1, %v4514_v46 }
 0x7d2   :  { %4122 = vmatpush3.bf16.msra.mxu0 %v4762_v63 }
 0x7d3   :  { %4123 = vmatprep.subr.bf16.mxu0 %v4512_v36 }
 0x7d4   :  { %4134 = vmatpush3.bf16.msra.mxu1 %v4766_v0 }
 0x7d5   :  { %4135 = vmatprep.subr.bf16.mxu1 %v4512_v36 }
 0x7d6   :  { %4125 = vmatpush3.bf16.msra.mxu0 %v4774_v5 }
 0x7d7   :  { %4126 = vmatprep.subr.bf16.mxu0 %v4512_v36 }
 0x7d8   :  { %4137 = vmatpush3.bf16.msra.mxu1 %v4778_v6 }
 0x7d9   :  { %4138 = vmatprep.subr.bf16.mxu1 %v4512_v36 }
 0x7da   :  { %4128 = vmatpush3.bf16.msra.mxu0 %v4782_v11 }
 0x7db   :  { %4142 = vmatprep.subr.msk.bf16.mxu0 %vm4810_vm12, %v4515_v26 }
 0x7dc   :  { %4140 = vmatpush3.bf16.msra.mxu1 %v4786_v12 }
 0x7dd   :  { %3860 = vmatprep.subr.msk.mxu1 %vm4894_vm6, %v4517_v10 }
 0x83f   :  { %v1851_v49 = vpop.permute.xlu1 %1850 }
 0x840   :  { %v1844_v53 = vpop.permute.xlu0 %1843  ;;  %vm1853_vm5 = vcmp.gt.f32.partialorder %v1851_v49, 0.0 }
 0x841   :  { %vm1852_vm13 = vcmp.gt.f32.partialorder %v1844_v53, 0.0 }
 0x8a0   :  { %v1481_v56 = vpop.f32.mrb[12].mxu0 }
 0x8a1   :  { %v3797_v58 = vpop.f32.mrb[13].mxu0 }
 0x8a2   :  { %v1553_v63 = vpop.f32.mrb[12].mxu1 }
 0x8a3   :  { %v1575_v0 = vrot.slane %v1553_v63, 7  ;;  %v3802_v5 = vpop.f32.mrb[13].mxu1 }
 0x8a5   :  { %v5019_v6 = vsel %vm996_vm9, %v1575_v0, %v1481_v56 }
 0x8a6   :  { %3820 = vmatmul.mubr.msk.f32.vlgmr.msra.gmra.mrb[14].mxu0 %vm158_vm0, %v5019_v6  ;;  %3839 = vmatmul.mubr.msk.f32.vlgmr.msra.gmra.mrb[14].mxu1 %vm158_vm0, %v5019_v6 }
 0x8a7   :  { %4144 = vmatpush3.bf16.msk.msra.mxu0 %vm4810_vm12, %v4515_v26  ;;  %3861 = vmatpush3.msk.msra.mxu1 %vm4894_vm6, %v4517_v10 }
 0x8a8   :  { %4146 = vmatprep.subr.msk.bf16.mxu0 %vm4820_vm15, %v4515_v26  ;;  %4157 = vmatprep.subr.bf16.mxu1 %v4512_v36 }
 0x8ab   :  { %4148 = vmatpush3.bf16.msk.msra.mxu0 %vm4820_vm15, %v4515_v26 }
 0x8ac   :  { %4150 = vmatprep.subr.msk.bf16.mxu0 %vm4834_vm8, %v4515_v26 }
 0x8af   :  { %4152 = vmatpush3.bf16.msk.msra.mxu0 %vm4834_vm8, %v4515_v26 }
 0x8b0   :  { %4154 = vmatprep.subr.msk.bf16.mxu0 %vm4844_vm3, %v4515_v26 }
 0x8b3   :  { %4156 = vmatpush3.bf16.msk.msra.mxu0 %vm4844_vm3, %v4515_v26 }
 0x8b4   :  { %3884 = vmatprep.subr.mxu0 %v4514_v46 }
 0x979   :  { %v1645_v11 = vpop.f32.mrb[14].mxu0  ;;  %v1715_v12 = vpop.f32.mrb[14].mxu1 }
 0x97a   :  { %v1716_v19 = vadd.f32 %v1715_v12, %v1645_v11  ;;  %v3821_v20 = vpop.f32.mrb[15].mxu0  ;;  %v3840_v21 = vpop.f32.mrb[15].mxu1 }
 0x97c   :  { %v1719_v22 = vadd.f32 %v1716_v19, %v4865_v41 }
 0x97e   :  { %v1727_v23 = vrot.slane %v1719_v22, %v4870_v51 }
 0x980   :  { %v1728_v24 = vcombine.high %v1727_v23, %v1727_v23  ;;  %v1735_v28 = vrot.slane %v1727_v23, %v4870_v51 }
 0x982   :  { %v1742_v30 = vrot.slane %v1728_v24, %v4870_v51  ;;  %v1746_v31 = vrot.slane %v1735_v28, %v4875_v57 }
 0x984   :  { %v1750_v44 = vrot.slane %v1742_v30, %v4875_v57  ;;  %v1753_v45 = vmul.f32 %v1746_v31, %v4859_v38 }
 0x986   :  { %3857 = vmatprep.mubr.msk.f32.mxu0 %vm158_vm0, %v1753_v45  ;;  %v1754_v48 = vmul.f32 %v4855_v35, %v1750_v44 }
 0x988   :  { %3858 = vmatmul.mubr.msk.f32.vlgmr.msra.gmra.mrb[16].mxu0 %vm158_vm0, %v1754_v48 }
 0x989   :  { %3885 = vmatpush3.xpose.msk.msra.mxu0 %vm158_vm0, %v4867_v42  ;;  %3886 = vmatprep.mubr.msk.f32.mxu0 %vm4513_vm1, %v4514_v46 }
 0x98a   :  { %3889 = vmatprep.subr.mxu0 %v4514_v46 }
 0xa5b   :  { %v3859_v54 = vpop.f32.mrb[16].mxu0 }
 0xa5c   :  { %v1837_v55 = vmul.f32 0.35355338, %v3859_v54  ;;  %v1827_v59 = vpop.f32.mrb[17].mxu0 }
 0xa5d   :  { %v1836_v32 = vmul.f32 0.35355338, %v1827_v59 }
 0xa5e   :  { %v1859_v60 = vsel %vm1853_vm5, -1e+09, %v1837_v55 }
 0xa5f   :  { %v1867_v17 = vsel %vm850_vm7, %v1859_v60, -inf  ;;  %v1858_v61 = vsel %vm1852_vm13, -1e+09, %v1836_v32 }
 0xa60   :  { %v1868_v62 = vrot.slane %v1867_v17, 4  ;;  %v1860_v2 = vsel %vm850_vm7, %v1858_v61, -inf }
 0xa61   :  { %v1861_v4 = vrot.slane %v1860_v2, 4 }
 0xa62   :  { %v1869_v7 = vmax.f32 %v1867_v17, %v1868_v62 }
 0xa63   :  { %v1862_v8 = vmax.f32 %v1860_v2, %v1861_v4 }
 0xa64   :  { %v1870_v13 = vrot.slane %v1869_v7, 2 }
 0xa65   :  { %v1863_v14 = vrot.slane %v1862_v8, 2 }
 0xa66   :  { %v1871_v15 = vmax.f32 %v1869_v7, %v1870_v13 }
 0xa67   :  { %v1864_v56 = vmax.f32 %v1862_v8, %v1863_v14 }
 0xa68   :  { %v1872_v58 = vrot.slane %v1871_v15, 1 }
 0xa69   :  { %v1865_v63 = vrot.slane %v1864_v56, 1 }
 0xa6a   :  { %v1873_v0 = vmax.f32 %v1871_v15, %v1872_v58 }
 0xa6b   :  { %v1866_v5 = vmax.f32 %v1864_v56, %v1865_v63 }
 0xa6c   :  { %v1875_v11 = vsub.f32 %v1859_v60, %v1873_v0 }
 0xa6d   :  { %v1874_v12 = vsub.f32 %v1858_v61, %v1866_v5 }
 0xa6e   :  { %v1878_v19 = vmul.f32 1.442695, %v1875_v11 }
 0xa6f   :  { %v1876_v20 = vmul.f32 1.442695, %v1874_v12 }
 0xa70   :  { %4258 = vpow2.f32 %v1878_v19 }
 0xa71   :  { %4260 = vpow2.f32 %v1876_v20 }
 0xa7a   :  { %v4259_v21 = vpop.eup %4258 }
 0xa7b   :  { %v4261_v22 = vpop.eup %4260  ;;  %v1887_v23 = vsel %vm850_vm7, %v4259_v21, 0.0 }
 0xa7c   :  { %v1888_v24 = vrot.slane %v1887_v23, 4  ;;  %v1880_v28 = vsel %vm850_vm7, %v4261_v22, 0.0 }
 0xa7d   :  { %v1881_v30 = vrot.slane %v1880_v28, 4 }
 0xa7e   :  { %v1889_v31 = vadd.f32 %v1888_v24, %v1887_v23 }
 0xa7f   :  { %v1882_v44 = vadd.f32 %v1881_v30, %v1880_v28 }
 0xa80   :  { %v1890_v45 = vrot.slane %v1889_v31, 2 }
 0xa81   :  { %v1883_v48 = vrot.slane %v1882_v44, 2 }
 0xa82   :  { %v1891_v49 = vadd.f32 %v1890_v45, %v1889_v31 }
 0xa83   :  { %v1884_v53 = vadd.f32 %v1883_v48, %v1882_v44  ;;  %v4290_v48 = vld [vmem:[#allocation2] sm:$0xff] }
 0xa84   :  { %v1892_v54 = vrot.slane %v1891_v49, 1 }
 0xa85   :  { %v1885_v55 = vrot.slane %v1884_v53, 1 }
 0xa86   :  { %v1893_v59 = vadd.f32 %v1892_v54, %v1891_v49 }
 0xa87   :  { %v1886_v32 = vadd.f32 %v1885_v55, %v1884_v53 }
 0xa88   :  { %4262 = vrcp.f32 %v1893_v59 }
 0xa89   :  { %4264 = vrcp.f32 %v1886_v32 }
 0xa92   :  { %v4263_v60 = vpop.eup %4262 }
 0xa93   :  { %v4265_v17 = vpop.eup %4264  ;;  %v1897_v62 = vmul.f32 %v4263_v60, %v4259_v21 }
 0xa94   :  { %v1895_v61 = vmul.f32 %v4265_v17, %v4261_v22 }
 0xa96   :  { %3862 = vmatprep.mubr.msk.f32.mxu1 %vm850_vm7, %v1895_v61 }
 0xa97   :  { %3863 = vmatmul.mubr.msk.f32.vlgmr.msra.gmra.mrb[16].mxu1 %vm850_vm7, %v1897_v62 }
 0xa98   :  { %4159 = vmatpush3.bf16.msra.mxu1 %v4913_v29  ;;  %3881 = vmatprep.mubr.msk.f32.mxu1 %vm4513_vm1, %v4514_v46 }
 0xa99   :  { %4160 = vmatprep.subr.bf16.mxu1 %v4512_v36 }
 0xa9c   :  { %4162 = vmatpush3.bf16.msra.mxu1 %v4917_v43 }
 0xa9d   :  { %4163 = vmatprep.subr.bf16.mxu1 %v4512_v36 }
 0xaa0   :  { %4165 = vmatpush3.bf16.msra.mxu1 %v4921_v47 }
 0xaa1   :  { %4166 = vmatprep.subr.bf16.mxu1 %v4512_v36 }
 0xaa4   :  { %4168 = vmatpush3.bf16.msra.mxu1 %v4925_v50 }
 0xaa5   :  { %3894 = vmatprep.subr.mxu1 %v4514_v46 }
 0xb6a   :  { %v3864_v2 = vpop.f32.mrb[16].mxu1 }
 0xb6b   :  { %v1980_v4 = vmul.f32 %v3864_v2, %v4857_v37  ;;  %v1970_v7 = vpop.f32.mrb[17].mxu1 }
 0xb6c   :  { %v1979_v8 = vmul.f32 %v1970_v7, %v4861_v39 }
 0xb6d   :  { %v1988_v13 = vsel %vm158_vm0, %v1980_v4, 0.0 }
 0xb6e   :  { %v1989_v14 = vrot.slane %v1988_v13, 4  ;;  %v1981_v15 = vsel %vm158_vm0, %v1979_v8, 0.0 }
 0xb6f   :  { %v1982_v56 = vrot.slane %v1981_v15, 4 }
 0xb70   :  { %v1990_v58 = vadd.f32 %v1989_v14, %v1988_v13 }
 0xb71   :  { %v1983_v63 = vadd.f32 %v1982_v56, %v1981_v15 }
 0xb72   :  { %v1991_v0 = vrot.slane %v1990_v58, 2 }
 0xb73   :  { %v1984_v5 = vrot.slane %v1983_v63, 2 }
 0xb74   :  { %v1992_v11 = vadd.f32 %v1991_v0, %v1990_v58 }
 0xb75   :  { %v1985_v12 = vadd.f32 %v1984_v5, %v1983_v63 }
 0xb76   :  { %v1993_v19 = vrot.slane %v1992_v11, 1 }
 0xb77   :  { %v1986_v20 = vrot.slane %v1985_v12, 1 }
 0xb78   :  { %v1994_v21 = vadd.f32 %v1993_v19, %v1992_v11 }
 0xb79   :  { %v1987_v22 = vadd.f32 %v1986_v20, %v1985_v12  ;;  %v4291_v20 = vld [vmem:[#allocation2 + $0x8] sm:$0xff] }
 0xb7b   :  { %v2005_v23 = vsel %vm996_vm9, %v1994_v21, %v1987_v22 }
 0xb7c   :  { %3882 = vmatmul.mubr.msk.f32.vlgmr.msra.gmra.mrb[18].mxu1 %vm158_vm0, %v2005_v23 }
 0xb7d   :  { %3895 = vmatpush3.msk.msra.mxu1 %vm550_vm11, %v4517_v10  ;;  %3896 = vmatprep.mubr.msk.f32.mxu1 %vm4513_vm1, %v4514_v46 }
 0xb7e   :  { %3904 = vmatprep.subr.mxu1 %v4514_v46 }
 0xc4f   :  { %v2074_v24 = vpop.f32.mrb[18].mxu1 }
 0xc50   :  { %v2085_v28 = vrot.slane %v2074_v24, %v4870_v51  ;;  %v3883_v30 = vpop.f32.mrb[19].mxu1 }
 0xc52   :  { %v2086_v31 = vcombine.high %v2085_v28, %v2085_v28  ;;  %v2093_v44 = vrot.slane %v2085_v28, %v4870_v51 }
 0xc54   :  { %3887 = vmatmul.mubr.msk.f32.vlgmr.msra.gmra.mrb[18].mxu0 %vm158_vm0, %v2093_v44  ;;  %v2100_v45 = vrot.slane %v2086_v31, %v4870_v51  ;;  %v2534_v44 = vld [vmem:[#allocation13] sm:$0xff] }
 0xc55   :  { %3890 = vmatpush3.xpose.msk.msra.mxu0 %vm158_vm0, %v4863_v40  ;;  %3891 = vmatprep.mubr.msk.f32.mxu0 %vm4513_vm1, %v4514_v46 }
 0xc56   :  { %3899 = vmatprep.subr.mxu0 %v4514_v46 }
 0xc58   :  { %3892 = vmatmul.mubr.msk.f32.vlgmr.msra.gmra.mrb[20].mxu0 %vm158_vm0, %v2100_v45  ;;  %v2535_v45 = vld [vmem:[#allocation13 + $0x8] sm:$0xff] }
 0xc59   :  { %3900 = vmatpush3.msra.mxu0 %v4290_v48  ;;  %3901 = vmatprep.mubr.msk.f32.mxu0 %vm4513_vm1, %v4514_v46 }
 0xc5a   :  { %4169 = vmatprep.subr.bf16.mxu0 %v4512_v36 }
 0xd27   :  { %v2169_v49 = vpop.f32.mrb[18].mxu0 }
 0xd28   :  { %v3888_v53 = vpop.f32.mrb[19].mxu0  ;;  %v2245_v54 = vmul.f32 0.125, %v2169_v49 }
 0xd2a   :  { %4266 = vtanh.f32 %v2245_v54  ;;  %v2526_v54 = vld [vmem:[#allocation11] sm:$0xff] }
 0xd2b   :  { %v2241_v55 = vpop.f32.mrb[20].mxu0 }
 0xd2c   :  { %v2246_v59 = vmul.f32 0.125, %v2241_v55  ;;  %v3893_v32 = vpop.f32.mrb[21].mxu0  ;;  %v2527_v55 = vld [vmem:[#allocation11 + $0x8] sm:$0xff] }
 0xd2e   :  { %4268 = vtanh.f32 %v2246_v59  ;;  %v4170_v59 = vpack.c.bf16 %v2535_v45, %v2534_v44 }
 0xd34   :  { %v4267_v60 = vpop.eup %4266 }
 0xd35   :  { %v2249_v62 = vmul.f32 10.0, %v4267_v60 }
 0xd38   :  { %v4269_v17 = vpop.eup %4268 }
 0xd39   :  { %v2250_v61 = vmul.f32 10.0, %v4269_v17 }
 0xd3b   :  { %v2254_v2 = vrot.slane %v2250_v61, 7 }
 0xd3d   :  { %v2255_v4 = vsel %vm996_vm9, %v2254_v2, %v2249_v62  ;;  %v2536_v62 = vld [vmem:[#allocation13 + $0x10] sm:$0xff]  ;;  %v2537_v2 = vld [vmem:[#allocation13 + $0x18] sm:$0xff] }
 0xd3e   :  { %v2257_v7 = vsel %vm2251_vm14, -1e+09, %v2255_v4  ;;  %v4182_v4 = vpack.c.bf16 %v2527_v55, %v2526_v54 }
 0xd3f   :  { %v2258_v8 = vsel %vm1256_vm10, %v2257_v7, -inf }
 0xd40   :  { %2259 = vmax.xlane.f32.xlu1 %v2258_v8  ;;  %v2529_v8 = vld [vmem:[#allocation11 + $0x18] sm:$0xff] }
 0xdcd   :  { %v2260_v13 = vpop.xlane.xlu1 %2259 }
 0xdce   :  { %v2261_v14 = vsub.f32 %v2257_v7, %v2260_v13 }
 0xdd0   :  { %v2262_v15 = vmul.f32 1.442695, %v2261_v14  ;;  %v2539_v14 = vld [vmem:[#allocation13 + $0x28] sm:$0xff] }
 0xdd2   :  { %4270 = vpow2.f32 %v2262_v15 }
 0xddc   :  { %v4271_v56 = vpop.eup %4270 }
 0xddd   :  { %v2264_v58 = vsel %vm1256_vm10, %v4271_v56, 0.0  ;;  %v2530_v56 = vld [vmem:[#allocation11 + $0x20] sm:$0xff] }
 0xdde   :  { %2265 = vadd.xlane.f32.xlu0 %v2264_v58  ;;  %v2531_v58 = vld [vmem:[#allocation11 + $0x28] sm:$0xff] }
 0xe6b   :  { %v2266_v63 = vpop.xlane.xlu0 %2265 }
 0xe6c   :  { %4272 = vlog2.f32 %v2266_v63 }
 0xe76   :  { %v4273_v0 = vpop.eup %4272 }
 0xe77   :  { %v2268_v5 = vmul.f32 0.6931472, %v4273_v0  ;;  %v4188_v0 = vpack.c.bf16 %v2531_v58, %v2530_v56 }
 0xe79   :  { %v2269_v11 = vadd.f32 %v2268_v5, %v2260_v13  ;;  %v4173_v13 = vpack.c.bf16 %v2537_v2, %v2536_v62  ;;  %v2532_v5 = vld [vmem:[#allocation11 + $0x30] sm:$0xff] }
 0xe7b   :  { %v2270_v12 = vsub.f32 %v2257_v7, %v2269_v11  ;;  %v2528_v7 = vld [vmem:[#allocation11 + $0x10] sm:$0xff]  ;;  %v2533_v11 = vld [vmem:[#allocation11 + $0x38] sm:$0xff] }
 0xe7c   :  { %v4185_v15 = vpack.c.bf16 %v2529_v8, %v2528_v7 }
 0xe7d   :  { %3897 = vmatmul.mubr.msk.f32.vlgmr.msra.gmra.mrb[20].mxu1 %vm850_vm7, %v2270_v12  ;;  %v2271_v19 = vsel %vm1256_vm10, %v2270_v12, -inf }
 0xe7e   :  { %2272 = vmax.xlane.f32.xlu0 %v2271_v19  ;;  %3905 = vmatpush3.msra.mxu1 %v4291_v20  ;;  %v2540_v19 = vld [vmem:[#allocation13 + $0x30] sm:$0xff]  ;;  %v2541_v20 = vld [vmem:[#allocation13 + $0x38] sm:$0xff] }
 0xe7f   :  { %3906 = vmatprep.mubr.msk.f32.mxu1 %vm4513_vm1, %v4514_v46  ;;  %4181 = vmatprep.subr.bf16.mxu1 %v4512_v36 }
 0xf0b   :  { %v2273_v21 = vpop.xlane.xlu0 %2272 }
 0xf0c   :  { %vm2274_vm4 = vcmp.ge.f32.partialorder %v2270_v12, %v2273_v21  ;;  %v4191_v12 = vpack.c.bf16 %v2533_v11, %v2532_v5  ;;  %v4179_v21 = vpack.c.bf16 %v2541_v20, %v2540_v19 }
 0xf0d   :  { %v2275_v22 = vsel %vm2274_vm4, %v4970_v52, 8.0 }
 0xf0e   :  { %v2276_v23 = vsel %vm1256_vm10, %v2275_v22, inf }
 0xf0f   :  { %2277 = vmin.xlane.f32.xlu1 %v2276_v23 }
 0xf50   :  { %v2348_v24 = vpop.f32.mrb[20].mxu1 }
 0xf51   :  { %v3898_v28 = vpop.f32.mrb[21].mxu1 }
 0xf9c   :  { %v2278_v30 = vpop.xlane.xlu1 %2277 }
 0xf9d   :  { %v2352_v31 = vsel %vm1383_vm2, %v2278_v30, %v2348_v24  ;;  %vm2355_vm5 = vcmp.eq.f32.partialorder %v4970_v52, %v2278_v30 }
 0xf9e   :  { %2354 = vst [vmem:[#allocation16 + $0x2] sm:$0x3] %v2352_v31  ;;  %v3411_v48 = vsel %vm2355_vm5, 1.0, %v4514_v46 }
 0xf9f   :  { %v5124_v49 = vmax.f32 %v4982_v3, %v3411_v48  ;;  %v2366_v53 = vrot.slane %v3411_v48, %v4870_v51 }
 0xfa1   :  { %v2367_v32 = vcombine.high %v2366_v53, %v2366_v53  ;;  %v2374_v60 = vrot.slane %v2366_v53, %v4870_v51  ;;  %v2817_v17 = vrot.slane %v5124_v49, %v1847_v1  ;;  %v2810_v61 = vrot.slane %v5124_v49, %v4875_v57  ;;  %v2538_v1 = vld [vmem:[#allocation13 + $0x20] sm:$0xff] }
 0xfa2   :  { %v4176_v63 = vpack.c.bf16 %v2539_v14, %v2538_v1 }
 0xfa3   :  { %v2381_v3 = vrot.slane %v2367_v32, %v4870_v51  ;;  %3902 = vmatmul.mubr.msk.f32.vlgmr.msra.gmra.mrb[22].mxu0 %vm850_vm7, %v2374_v60  ;;  %2819 = vbcast.lane.b32.xlu1 %v2817_v17, 256 }
 0xfa4   :  { %2812 = vbcast.lane.b32.xlu0 %v2810_v61, 256  ;;  %4171 = vmatpush3.bf16.msra.mxu0 %v4170_v59 }
 0xfa5   :  { %3907 = vmatmul.mubr.msk.f32.vlgmr.msra.gmra.mrb[22].mxu1 %vm850_vm7, %v2381_v3  ;;  %4172 = vmatprep.subr.bf16.mxu0 %v4512_v36 }
 0xfa6   :  { %4183 = vmatpush3.bf16.msra.mxu1 %v4182_v4  ;;  %3944 = vmatprep.mubr.msk.f32.mxu1 %vm4513_vm1, %v4514_v46 }
 0xfa7   :  { %4184 = vmatprep.subr.bf16.mxu1 %v4512_v36  ;;  %3925 = vmatprep.mubr.msk.f32.mxu0 %vm4513_vm1, %v4514_v46 }
 0xfa8   :  { %4174 = vmatpush3.bf16.msra.mxu0 %v4173_v13 }
 0xfa9   :  { %4175 = vmatprep.subr.bf16.mxu0 %v4512_v36 }
 0xfaa   :  { %4186 = vmatpush3.bf16.msra.mxu1 %v4185_v15 }
 0xfab   :  { %4187 = vmatprep.subr.bf16.mxu1 %v4512_v36 }
 0xfac   :  { %4177 = vmatpush3.bf16.msra.mxu0 %v4176_v63 }
 0xfad   :  { %4178 = vmatprep.subr.bf16.mxu0 %v4512_v36 }
 0xfae   :  { %4189 = vmatpush3.bf16.msra.mxu1 %v4188_v0 }
 0xfaf   :  { %4190 = vmatprep.subr.bf16.mxu1 %v4512_v36 }
 0xfb0   :  { %4180 = vmatpush3.bf16.msra.mxu0 %v4179_v21 }
 0xfb1   :  { %4194 = vmatprep.subr.msk.bf16.mxu0 %vm4810_vm12, %v4515_v26 }
 0xfb2   :  { %4192 = vmatpush3.bf16.msra.mxu1 %v4191_v12 }
 0xfb3   :  { %3966 = vmatprep.subr.msk.mxu1 %vm4894_vm6, %v4517_v10 }
 0xfb5   :  { %3945 = vmatmul.mubr.msk.f32.vlgmr.msra.gmra.mrb[24].mxu1 %vm158_vm0, %v5019_v6 }
 0xfb6   :  { %3967 = vmatpush3.msk.msra.mxu1 %vm4894_vm6, %v4517_v10 }
 0xfb7   :  { %4209 = vmatprep.subr.bf16.mxu1 %v4512_v36 }
0x1016   :  { %v2813_v32 = vpop.permute.xlu0 %2812 }
0x1076   :  { %v2450_v22 = vpop.f32.mrb[22].mxu0 }
0x1077   :  { %v3903_v23 = vpop.f32.mrb[23].mxu0 }
0x1078   :  { %v2522_v24 = vpop.f32.mrb[22].mxu1 }
0x1079   :  { %v2544_v28 = vrot.slane %v2522_v24, 7  ;;  %v3908_v30 = vpop.f32.mrb[23].mxu1 }
0x107b   :  { %v2545_v6 = vsel %vm996_vm9, %v2544_v28, %v2450_v22 }
0x107c   :  { %3926 = vmatmul.mubr.msk.f32.vlgmr.msra.gmra.mrb[24].mxu0 %vm158_vm0, %v2545_v6 }
0x107d   :  { %4196 = vmatpush3.bf16.msk.msra.mxu0 %vm4810_vm12, %v4515_v26 }
0x107e   :  { %4198 = vmatprep.subr.msk.bf16.mxu0 %vm4820_vm15, %v4515_v26 }
0x1081   :  { %4200 = vmatpush3.bf16.msk.msra.mxu0 %vm4820_vm15, %v4515_v26  ;;  %vm2821_vm15 = vcmp.gt.f32.partialorder %v2813_v32, 0.0 }
0x1082   :  { %4202 = vmatprep.subr.msk.bf16.mxu0 %vm4834_vm8, %v4515_v26 }
0x1085   :  { %4204 = vmatpush3.bf16.msk.msra.mxu0 %vm4834_vm8, %v4515_v26  ;;  %vm3220_vm8 = vcmp.gt.f32.partialorder %v5124_v49, 0.0 }
0x1086   :  { %4206 = vmatprep.subr.msk.bf16.mxu0 %vm4844_vm3, %v4515_v26 }
0x1088   :  { %v2684_v25 = vpop.f32.mrb[24].mxu1 }
0x1089   :  { %v3946_v9 = vpop.f32.mrb[25].mxu1  ;;  %4208 = vmatpush3.bf16.msk.msra.mxu0 %vm4844_vm3, %v4515_v26 }
0x108a   :  { %3990 = vmatprep.subr.mxu0 %v4514_v46 }
0x114f   :  { %v2614_v27 = vpop.f32.mrb[24].mxu0 }
0x1150   :  { %v2685_v31 = vadd.f32 %v2684_v25, %v2614_v27  ;;  %v3927_v44 = vpop.f32.mrb[25].mxu0 }
0x1152   :  { %v2688_v45 = vadd.f32 %v2685_v31, %v4865_v41  ;;  %v2820_v41 = vpop.permute.xlu1 %2819 }
0x1153   :  { %vm2822_vm12 = vcmp.gt.f32.partialorder %v2820_v41, 0.0 }
0x1154   :  { %v2696_v33 = vrot.slane %v2688_v45, %v4870_v51 }
0x1156   :  { %v2697_v48 = vcombine.high %v2696_v33, %v2696_v33  ;;  %v2704_v53 = vrot.slane %v2696_v33, %v4870_v51 }
0x1158   :  { %v2711_v54 = vrot.slane %v2697_v48, %v4870_v51  ;;  %v2715_v55 = vrot.slane %v2704_v53, %v4875_v57 }
0x115a   :  { %v2719_v59 = vrot.slane %v2711_v54, %v4875_v57  ;;  %v2722_v26 = vmul.f32 %v2715_v55, %v4859_v38 }
0x115c   :  { %3963 = vmatprep.mubr.msk.f32.mxu0 %vm158_vm0, %v2722_v26  ;;  %v2723_v34 = vmul.f32 %v4855_v35, %v2719_v59 }
0x115e   :  { %3964 = vmatmul.mubr.msk.f32.vlgmr.msra.gmra.mrb[26].mxu0 %vm158_vm0, %v2723_v34 }
0x115f   :  { %3991 = vmatpush3.xpose.msk.msra.mxu0 %vm158_vm0, %v4867_v42  ;;  %3992 = vmatprep.mubr.msk.f32.mxu0 %vm4513_vm1, %v4514_v46 }
0x1160   :  { %3995 = vmatprep.subr.mxu0 %v4514_v46 }
0x1231   :  { %v3965_v60 = vpop.f32.mrb[26].mxu0 }
0x1232   :  { %v2806_v57 = vmul.f32 0.35355338, %v3965_v60  ;;  %v2796_v17 = vpop.f32.mrb[27].mxu0 }
0x1233   :  { %v2805_v38 = vmul.f32 0.35355338, %v2796_v17 }
0x1234   :  { %v2828_v61 = vsel %vm2822_vm12, -1e+09, %v2806_v57 }
0x1235   :  { %v2836_v35 = vsel %vm850_vm7, %v2828_v61, -inf  ;;  %v2827_v62 = vsel %vm2821_vm15, -1e+09, %v2805_v38 }
0x1236   :  { %v2837_v2 = vrot.slane %v2836_v35, 4  ;;  %v2829_v42 = vsel %vm850_vm7, %v2827_v62, -inf }
0x1237   :  { %v2830_v4 = vrot.slane %v2829_v42, 4 }
0x1238   :  { %v2838_v3 = vmax.f32 %v2836_v35, %v2837_v2 }
0x1239   :  { %v2831_v7 = vmax.f32 %v2829_v42, %v2830_v4 }
0x123a   :  { %v2839_v8 = vrot.slane %v2838_v3, 2 }
0x123b   :  { %v2832_v13 = vrot.slane %v2831_v7, 2 }
0x123c   :  { %v2840_v1 = vmax.f32 %v2838_v3, %v2839_v8 }
0x123d   :  { %v2833_v14 = vmax.f32 %v2831_v7, %v2832_v13 }
0x123e   :  { %v2841_v15 = vrot.slane %v2840_v1, 1 }
0x123f   :  { %v2834_v56 = vrot.slane %v2833_v14, 1 }
0x1240   :  { %v2842_v58 = vmax.f32 %v2840_v1, %v2841_v15 }
0x1241   :  { %v2835_v63 = vmax.f32 %v2833_v14, %v2834_v56 }
0x1242   :  { %v2844_v0 = vsub.f32 %v2828_v61, %v2842_v58 }
0x1243   :  { %v2843_v5 = vsub.f32 %v2827_v62, %v2835_v63 }
0x1244   :  { %v2847_v11 = vmul.f32 1.442695, %v2844_v0 }
0x1245   :  { %v2845_v12 = vmul.f32 1.442695, %v2843_v5 }
0x1246   :  { %4274 = vpow2.f32 %v2847_v11 }
0x1247   :  { %4276 = vpow2.f32 %v2845_v12 }
0x1250   :  { %v4275_v19 = vpop.eup %4274 }
0x1251   :  { %v4277_v20 = vpop.eup %4276  ;;  %v2856_v21 = vsel %vm850_vm7, %v4275_v19, 0.0 }
0x1252   :  { %v2857_v22 = vrot.slane %v2856_v21, 4  ;;  %v2849_v23 = vsel %vm850_vm7, %v4277_v20, 0.0 }
0x1253   :  { %v2850_v24 = vrot.slane %v2849_v23, 4 }
0x1254   :  { %v2858_v28 = vadd.f32 %v2857_v22, %v2856_v21 }
0x1255   :  { %v2851_v30 = vadd.f32 %v2850_v24, %v2849_v23 }
0x1256   :  { %v2859_v6 = vrot.slane %v2858_v28, 2 }
0x1257   :  { %v2852_v25 = vrot.slane %v2851_v30, 2 }
0x1258   :  { %v2860_v9 = vadd.f32 %v2859_v6, %v2858_v28 }
0x1259   :  { %v2853_v27 = vadd.f32 %v2852_v25, %v2851_v30 }
0x125a   :  { %v2861_v31 = vrot.slane %v2860_v9, 1 }
0x125b   :  { %v2854_v44 = vrot.slane %v2853_v27, 1 }
0x125c   :  { %v2862_v45 = vadd.f32 %v2861_v31, %v2860_v9 }
0x125d   :  { %v2855_v33 = vadd.f32 %v2854_v44, %v2853_v27 }
0x125e   :  { %4278 = vrcp.f32 %v2862_v45 }
0x125f   :  { %4280 = vrcp.f32 %v2855_v33 }
0x1268   :  { %v4279_v48 = vpop.eup %4278 }
0x1269   :  { %v4281_v53 = vpop.eup %4280  ;;  %v2866_v55 = vmul.f32 %v4279_v48, %v4275_v19 }
0x126a   :  { %v2864_v54 = vmul.f32 %v4281_v53, %v4277_v20 }
0x126c   :  { %3968 = vmatprep.mubr.msk.f32.mxu1 %vm850_vm7, %v2864_v54 }
0x126d   :  { %3969 = vmatmul.mubr.msk.f32.vlgmr.msra.gmra.mrb[26].mxu1 %vm850_vm7, %v2866_v55 }
0x126e   :  { %4211 = vmatpush3.bf16.msra.mxu1 %v4913_v29  ;;  %3987 = vmatprep.mubr.msk.f32.mxu1 %vm4513_vm1, %v4514_v46 }
0x126f   :  { %4212 = vmatprep.subr.bf16.mxu1 %v4512_v36 }
0x1272   :  { %4214 = vmatpush3.bf16.msra.mxu1 %v4917_v43 }
0x1273   :  { %4215 = vmatprep.subr.bf16.mxu1 %v4512_v36 }
0x1276   :  { %4217 = vmatpush3.bf16.msra.mxu1 %v4921_v47 }
0x1277   :  { %4218 = vmatprep.subr.bf16.mxu1 %v4512_v36 }
0x127a   :  { %4220 = vmatpush3.bf16.msra.mxu1 %v4925_v50 }
0x127b   :  { %4000 = vmatprep.subr.mxu1 %v4514_v46 }
0x1340   :  { %v3970_v59 = vpop.f32.mrb[26].mxu1 }
0x1341   :  { %v2949_v29 = vmul.f32 %v3970_v59, %v4857_v37  ;;  %v2939_v26 = vpop.f32.mrb[27].mxu1 }
0x1342   :  { %v2948_v34 = vmul.f32 %v2939_v26, %v4861_v39 }
0x1343   :  { %v2957_v41 = vsel %vm158_vm0, %v2949_v29, 0.0 }
0x1344   :  { %v2958_v32 = vrot.slane %v2957_v41, 4  ;;  %v2950_v43 = vsel %vm158_vm0, %v2948_v34, 0.0 }
0x1345   :  { %v2951_v60 = vrot.slane %v2950_v43, 4 }
0x1346   :  { %v2959_v57 = vadd.f32 %v2958_v32, %v2957_v41 }
0x1347   :  { %v2952_v47 = vadd.f32 %v2951_v60, %v2950_v43 }
0x1348   :  { %v2960_v17 = vrot.slane %v2959_v57, 2 }
0x1349   :  { %v2953_v36 = vrot.slane %v2952_v47, 2 }
0x134a   :  { %v2961_v38 = vadd.f32 %v2960_v17, %v2959_v57 }
0x134b   :  { %v2954_v50 = vadd.f32 %v2953_v36, %v2952_v47 }
0x134c   :  { %v2962_v61 = vrot.slane %v2961_v38, 1 }
0x134d   :  { %v2955_v35 = vrot.slane %v2954_v50, 1 }
0x134e   :  { %v2963_v62 = vadd.f32 %v2962_v61, %v2961_v38 }
0x134f   :  { %v2956_v2 = vadd.f32 %v2955_v35, %v2954_v50 }
0x1351   :  { %v2974_v37 = vsel %vm996_vm9, %v2963_v62, %v2956_v2 }
0x1352   :  { %3988 = vmatmul.mubr.msk.f32.vlgmr.msra.gmra.mrb[28].mxu1 %vm158_vm0, %v2974_v37 }
0x1353   :  { %4001 = vmatpush3.msk.msra.mxu1 %vm550_vm11, %v4517_v10  ;;  %4002 = vmatprep.mubr.msk.f32.mxu1 %vm4513_vm1, %v4514_v46 }
0x1425   :  { %v3043_v39 = vpop.f32.mrb[28].mxu1 }
0x1426   :  { %v3054_v42 = vrot.slane %v3043_v39, %v4870_v51  ;;  %v3989_v4 = vpop.f32.mrb[29].mxu1 }
0x1428   :  { %v3055_v3 = vcombine.high %v3054_v42, %v3054_v42  ;;  %v3062_v7 = vrot.slane %v3054_v42, %v4870_v51 }
0x142a   :  { %3993 = vmatmul.mubr.msk.f32.vlgmr.msra.gmra.mrb[28].mxu0 %vm158_vm0, %v3062_v7  ;;  %v3069_v18 = vrot.slane %v3055_v3, %v4870_v51 }
0x142b   :  { %3996 = vmatpush3.xpose.msk.msra.mxu0 %vm158_vm0, %v4863_v40  ;;  %3997 = vmatprep.mubr.msk.f32.mxu0 %vm4513_vm1, %v4514_v46 }
0x142e   :  { %3998 = vmatmul.mubr.msk.f32.vlgmr.msra.gmra.mrb[30].mxu0 %vm158_vm0, %v3069_v18 }
0x14fd   :  { %v3138_v10 = vpop.f32.mrb[28].mxu0 }
0x14fe   :  { %v3994_v8 = vpop.f32.mrb[29].mxu0  ;;  %v3214_v13 = vmul.f32 0.125, %v3138_v10 }
0x1500   :  { %4282 = vtanh.f32 %v3214_v13 }
0x1501   :  { %v3210_v1 = vpop.f32.mrb[30].mxu0 }
0x1502   :  { %v3215_v14 = vmul.f32 0.125, %v3210_v1  ;;  %v3999_v15 = vpop.f32.mrb[31].mxu0 }
0x1504   :  { %4284 = vtanh.f32 %v3215_v14 }
0x150a   :  { %v4283_v56 = vpop.eup %4282 }
0x150b   :  { %v3218_v0 = vmul.f32 10.0, %v4283_v56 }
0x150e   :  { %v4285_v58 = vpop.eup %4284 }
0x150f   :  { %v3219_v63 = vmul.f32 10.0, %v4285_v58 }
0x1511   :  { %v3223_v40 = vrot.slane %v3219_v63, 7 }
0x1513   :  { %v3224_v46 = vsel %vm996_vm9, %v3223_v40, %v3218_v0 }
0x1514   :  { %v3226_v51 = vsel %vm3220_vm8, -1e+09, %v3224_v46 }
0x1515   :  { %v3227_v5 = vsel %vm1256_vm10, %v3226_v51, -inf }
0x1516   :  { %3228 = vmax.xlane.f32.xlu1 %v3227_v5 }
0x15a3   :  { %v3229_v11 = vpop.xlane.xlu1 %3228 }
0x15a4   :  { %v3230_v12 = vsub.f32 %v3226_v51, %v3229_v11 }
0x15a6   :  { %v3231_v19 = vmul.f32 1.442695, %v3230_v12 }
0x15a8   :  { %4286 = vpow2.f32 %v3231_v19 }
0x15b2   :  { %v4287_v20 = vpop.eup %4286 }
0x15b3   :  { %v3233_v21 = vsel %vm1256_vm10, %v4287_v20, 0.0 }
0x15b4   :  { %3234 = vadd.xlane.f32.xlu0 %v3233_v21 }
0x1641   :  { %v3235_v22 = vpop.xlane.xlu0 %3234 }
0x1642   :  { %4288 = vlog2.f32 %v3235_v22 }
0x164c   :  { %v4289_v23 = vpop.eup %4288 }
0x164d   :  { %v3237_v24 = vmul.f32 0.6931472, %v4289_v23 }
0x164f   :  { %v3238_v28 = vadd.f32 %v3237_v24, %v3229_v11 }
0x1651   :  { %v3239_v49 = vsub.f32 %v3226_v51, %v3238_v28 }
0x1653   :  { %4003 = vmatmul.mubr.msk.f32.vlgmr.msra.gmra.mrb[30].mxu1 %vm850_vm7, %v3239_v49  ;;  %v3240_v30 = vsel %vm1256_vm10, %v3239_v49, -inf }
0x1654   :  { %3241 = vmax.xlane.f32.xlu0 %v3240_v30 }
0x16e1   :  { %v3242_v6 = vpop.xlane.xlu0 %3241 }
0x16e2   :  { %vm3243_vm0 = vcmp.ge.f32.partialorder %v3239_v49, %v3242_v6 }
0x16e3   :  { %v3244_v25 = vsel %vm3243_vm0, %v4970_v52, 8.0 }
0x16e4   :  { %v3245_v9 = vsel %vm1256_vm10, %v3244_v25, inf }
0x16e5   :  { %3246 = vmin.xlane.f32.xlu1 %v3245_v9 }
0x1726   :  { %v3317_v27 = vpop.f32.mrb[30].mxu1 }
0x1727   :  { %v4004_v31 = vpop.f32.mrb[31].mxu1 }
0x1772   :  { %v3247_v44 = vpop.xlane.xlu1 %3246 }
0x1773   :  { %v3321_v45 = vsel %vm1383_vm2, %v3247_v44, %v3317_v27 }
0x1774   :  { %3323 = vst [vmem:[#allocation16 + $0x4] sm:$0x3] %v3321_v45 }
0x1775   :  { %4479 = shalt.err (!%p4476_p12)
}
0x1776   :  { %s4480_s19 = scalar_lea.hbm %s5267_s11, 96 }
0x1777   :  { %p4481_p13 = scmp.ne.s32.totalorder %s5267_s11, %s4480_s19  ;;  %p4484_p0 = scmp.lt.u32.totalorder %s4480_s19, %s5267_s11 }
0x1779   :  { %p4486_p1 = pnand %p4484_p0, %p4481_p13 }
0x177b   :  { %4489 = shalt.err (!%p4486_p1)
}
0x177c   :  { %s4519_s23 = smov 32   ;;  %s4520_s5 = smov 2  }
0x177d   :  { %3335 = dma.vmem_to_hbm [thread:$0]  %s3330_s10, 96, %s5267_s11, [#allocation4], %s4519_s23, %s4519_s23, %s4520_s5  }
0x177e   :  { %4500 = dma.done.wait [#allocation4], 96  }
0x177f   :  { %4501 = vsyncadd [#allocation4], 4294967200 }
0x1780   :  { %3339 = vsyncpa [#allocation3], 1 }
0x1781   :  { %3340 = vsyncpa [#allocation6], 1 }
0x1782   :  { %3341 = vsyncpa [#allocation9], 1 }
0x1783   :  { %3342 = vsyncpa [#allocation12], 1 }
0x1784   :  { %3343 = vsyncpa [#allocation15], 1 }
0x1785   :  { %3344 = vsyncpa [#allocation4], 1 }

</bundles_post_ra>
